<compile_context>
chip_gen: v6e
topology: v6e:2x2x1
jax: 0.10.0
libtpu: 0.0.40
codegen_flags: <defaults>
</compile_context>

<pallas_src>
import functools
import math

import jax
import jax.numpy as jnp
from jax.experimental import pallas as pl
from jax.experimental.pallas import tpu as pltpu


# ----------------------------- kernel helpers --------------------------------


def _layernorm(v, g, b, eps=1e-5):
    # fp32 LayerNorm (matches the fp16-safe LayerNorm subclass: compute in fp32)
    mu = jnp.mean(v, axis=-1, keepdims=True)
    var = jnp.mean((v - mu) ** 2, axis=-1, keepdims=True)
    return (v - mu) * jax.lax.rsqrt(var + eps) * g + b


def _gelu_tanh(u):
    # nn.GELU(approximate='tanh')
    c = 0.7978845608028654  # sqrt(2/pi)
    return 0.5 * u * (1.0 + jnp.tanh(c * (u + 0.044715 * u * u * u)))


# ----------------------------- kernel -----------------------------------------


def resblock_kernel(x_ref,
                    ln1g_ref, ln1b_ref,
                    wqkv_ref, bqkv_ref,
                    wo_ref, bo_ref,
                    ln2g_ref, ln2b_ref,
                    wfc_ref, bfc_ref,
                    wproj_ref, bproj_ref,
                    o_ref,
                    *, n_head: int):
    B, L, D = x_ref.shape
    H = n_head
    hd = D // H

    # Flattened (B*L, D) row block so every dense matmul gets a big M.
    x = x_ref[...].astype(jnp.float32).reshape(B * L, D)

    # ---- ln_1 + multi-head self-attention ------------------------------------
    y = _layernorm(x, ln1g_ref[0], ln1b_ref[0])

    # 1/sqrt(head_dim) is already folded into the q columns of wqkv/bqkv.
    qkv = jnp.dot(y.astype(jnp.bfloat16), wqkv_ref[...],
                  preferred_element_type=jnp.float32) + bqkv_ref[0]   # (B*L, 3D) f32
    qkv = qkv.astype(jnp.bfloat16).reshape(B, L, 3 * D)               # single downcast

    def heads(col0):
        # Gather H per-head (B, L, hd) lane slices into a fused (H*B, L, hd) batch.
        return jnp.concatenate(
            [qkv[:, :, col0 + h * hd: col0 + (h + 1) * hd] for h in range(H)], axis=0)

    qh = heads(0)
    kh = heads(D)
    vh = heads(2 * D)

    # Batched attention over the fused (head, batch) axis — no per-head matmuls,
    # no explicit transposes (the contraction consumes k's last dim directly).
    s = jnp.einsum('bld,bmd->blm', qh, kh,
                   preferred_element_type=jnp.float32)                 # (H*B, L, L)
    s = s - jnp.max(s, axis=-1, keepdims=True)
    p = jnp.exp(s)
    l = jnp.sum(p, axis=-1, keepdims=True)
    ctx = jnp.einsum('blm,bmd->bld', p.astype(jnp.bfloat16), vh,
                     preferred_element_type=jnp.float32)               # (H*B, L, hd)
    # Normalize after P@V: L*hd multiplies instead of L*L; reciprocal on the EUP slot.
    ctx = ctx * pl.reciprocal(l, approx=True)

    # Merge heads back to (B*L, D) in the original column (head-major) order.
    ctx4 = ctx.astype(jnp.bfloat16).reshape(H, B, L, hd)
    attn = jnp.concatenate([ctx4[h] for h in range(H)], axis=-1)       # (B, L, D) bf16
    attn = attn.reshape(B * L, D)

    attn = jnp.dot(attn, wo_ref[...],
                   preferred_element_type=jnp.float32) + bo_ref[0]
    x = x + attn

    # ---- ln_2 + MLP -----------------------------------------------------------
    y2 = _layernorm(x, ln2g_ref[0], ln2b_ref[0])
    h1 = jnp.dot(y2.astype(jnp.bfloat16), wfc_ref[...],
                 preferred_element_type=jnp.float32) + bfc_ref[0]
    h1 = _gelu_tanh(h1)
    h2 = jnp.dot(h1.astype(jnp.bfloat16), wproj_ref[...],
                 preferred_element_type=jnp.float32) + bproj_ref[0]
    x = x + h2

    o_ref[...] = x.reshape(B, L, D).astype(o_ref.dtype)


# ----------------------------- wrapper ------------------------------------------


def _vmem_capacity_bytes():
    try:
        return int(pltpu.get_tpu_info().vmem_capacity_bytes)
    except Exception:
        return None


def _target_rows(vmem_cap):
    # 128 MiB parts (v5e/v6e): feed the MXU with M ~512. 64 MiB (v7x) or unknown: 256.
    if vmem_cap is not None and vmem_cap >= (100 << 20):
        return 512
    return 256


def _pick_batch_block(N, L, target_rows):
    divisors = [d for d in range(1, N + 1) if N % d == 0]
    fits = [d for d in divisors if d * L <= max(target_rows, L)]
    best = max(fits)
    # Keep at least two grid steps when possible so the 'parallel' batch axis can shard
    # across both TensorCores on v7x (near-free elsewhere: constant-index weight blocks
    # are not re-fetched between steps).
    if N > 1 and N // best == 1:
        smaller = [d for d in fits if d < N]
        if smaller:
            best = max(smaller)
    return best


def _resblock_vmem_bytes(B, L, D, H, single_buffer_weights):
    hd = D // H
    wbuf = 1 if single_buffer_weights else 2
    weights = wbuf * 12 * D * D * 2                     # bf16 dense weights resident
    small = wbuf * 16 * D * 4                           # LN params + biases (f32)
    io = 2 * 2 * B * L * D * 4                          # double-buffered x in + out
    acts = B * L * (3 * D * 6 + 4 * D * 6)              # qkv / h1 f32 + bf16 copies
    heads = 3 * B * H * L * hd * 2 + 2 * B * H * L * L * 4
    return weights + small + io + acts + heads


def _const_block_spec(shape, single_buffer):
    ndim = len(shape)
    index_map = lambda n: (0,) * ndim
    if single_buffer:
        try:
            # Constant-index block: one resident copy is enough.
            return pl.BlockSpec(shape, index_map, pipeline_mode=pl.Buffered(1))
        except Exception:
            pass
    return pl.BlockSpec(shape, index_map)


def residual_attention_block(x_nld, params, n_head, *, aggressive=True, batch_block=None):
    """x_nld: (N, L, D). params: one layer of prepare_params() output (bf16 weights)."""
    N, L, D = x_nld.shape
    assert D % n_head == 0

    vmem_cap = _vmem_capacity_bytes()
    if batch_block is None:
        batch_block = _pick_batch_block(N, L, _target_rows(vmem_cap))
    assert N % batch_block == 0
    grid = (N // batch_block,)

    vmem_est = _resblock_vmem_bytes(batch_block, L, D, n_head, aggressive)
    cap = (vmem_cap if vmem_cap is not None else (64 << 20)) - (8 << 20)
    vmem_limit = int(max(16 << 20, min(cap, max(32 << 20, 2 * vmem_est))))

    const = lambda shape: _const_block_spec(shape, single_buffer=aggressive)

    extra = {}
    if aggressive:
        extra["input_output_aliases"] = {0: 0}   # reuse x's HBM buffer for the output

    return pl.pallas_call(
        functools.partial(resblock_kernel, n_head=n_head),
        out_shape=jax.ShapeDtypeStruct((N, L, D), x_nld.dtype),
        grid_spec=pltpu.PrefetchScalarGridSpec(
            num_scalar_prefetch=0,
            grid=grid,
            in_specs=[
                pl.BlockSpec((batch_block, L, D), lambda n: (n, 0, 0)),   # x
                const((1, D)), const((1, D)),                             # ln_1 g/b
                const((D, 3 * D)), const((1, 3 * D)),                     # in_proj W, b
                const((D, D)), const((1, D)),                             # out_proj W, b
                const((1, D)), const((1, D)),                             # ln_2 g/b
                const((D, 4 * D)), const((1, 4 * D)),                     # c_fc W, b
                const((4 * D, D)), const((1, D)),                         # c_proj W, b
            ],
            out_specs=pl.BlockSpec((batch_block, L, D), lambda n: (n, 0, 0)),
        ),
        compiler_params=pltpu.CompilerParams(
            dimension_semantics=("parallel",),
            vmem_limit_bytes=vmem_limit,
        ),
        **extra,
    )(x_nld,
      params["ln1_g"], params["ln1_b"],
      params["w_qkv"], params["b_qkv"],
      params["w_out"], params["b_out"],
      params["ln2_g"], params["ln2_b"],
      params["w_fc"], params["b_fc"],
      params["w_proj"], params["b_proj"])


def make_transformer_params(key, width, layers):
    """Deterministic synthetic fp32 math parameters. Linear weights are stored
    pre-transposed (in_features, out_features) so the math is x @ W + b."""
    D = width
    params = []
    for _ in range(layers):
        keys = jax.random.split(key, 5)
        key = keys[0]
        p = {
            "ln1_g": jnp.ones((1, D), jnp.float32),
            "ln1_b": jnp.zeros((1, D), jnp.float32),
            "w_qkv": 0.02 * jax.random.normal(keys[1], (D, 3 * D), jnp.float32),
            "b_qkv": jnp.zeros((1, 3 * D), jnp.float32),
            "w_out": 0.02 * jax.random.normal(keys[2], (D, D), jnp.float32),
            "b_out": jnp.zeros((1, D), jnp.float32),
            "ln2_g": jnp.ones((1, D), jnp.float32),
            "ln2_b": jnp.zeros((1, D), jnp.float32),
            "w_fc": 0.02 * jax.random.normal(keys[3], (D, 4 * D), jnp.float32),
            "b_fc": jnp.zeros((1, 4 * D), jnp.float32),
            "w_proj": 0.02 * jax.random.normal(keys[4], (4 * D, D), jnp.float32),
            "b_proj": jnp.zeros((1, D), jnp.float32),
        }
        params.append(p)
    return params


def prepare_params(params, n_head):
    """One-time kernel parameter prep: fold 1/sqrt(head_dim) into the q columns of
    w_qkv/b_qkv and cast all dense weights to bf16 (done once, not per forward)."""
    prepared = []
    for p in params:
        D = p["w_qkv"].shape[0]
        hd = D // n_head
        scale = 1.0 / math.sqrt(hd)
        col_scale = jnp.concatenate(
            [jnp.full((D,), scale, jnp.float32), jnp.ones((2 * D,), jnp.float32)])
        prepared.append({
            "ln1_g": p["ln1_g"], "ln1_b": p["ln1_b"],
            "w_qkv": (p["w_qkv"] * col_scale[None, :]).astype(jnp.bfloat16),
            "b_qkv": p["b_qkv"] * col_scale[None, :],
            "w_out": p["w_out"].astype(jnp.bfloat16), "b_out": p["b_out"],
            "ln2_g": p["ln2_g"], "ln2_b": p["ln2_b"],
            "w_fc": p["w_fc"].astype(jnp.bfloat16), "b_fc": p["b_fc"],
            "w_proj": p["w_proj"].astype(jnp.bfloat16), "b_proj": p["b_proj"],
        })
    return prepared


@functools.partial(jax.jit, static_argnames=("n_head", "aggressive"))
def transformer_forward(x_lnd, params, n_head, aggressive=True):
    """x_lnd: (L, N, D), same axis convention as the PyTorch module."""
    x = jnp.transpose(x_lnd, (1, 0, 2))          # -> (N, L, D) kernel layout
    for p in params:
        x = residual_attention_block(x, p, n_head, aggressive=aggressive)
    return jnp.transpose(x, (1, 0, 2))           # -> (L, N, D)


# ----------------------------- pure-JAX reference -------------------------------


def reference_forward(x_lnd, params, n_head):
    x = jnp.transpose(x_lnd, (1, 0, 2)).astype(jnp.float32)   # (N, L, D)
    N, L, D = x.shape
    H = n_head
    hd = D // H
    for p in params:
        y = _layernorm(x, p["ln1_g"][0], p["ln1_b"][0])
        qkv = y @ p["w_qkv"] + p["b_qkv"][0]
        q, k, v = qkv[..., :D], qkv[..., D:2 * D], qkv[..., 2 * D:]
        q = q.reshape(N, L, H, hd).transpose(0, 2, 1, 3) / math.sqrt(hd)
        k = k.reshape(N, L, H, hd).transpose(0, 2, 1, 3)
        v = v.reshape(N, L, H, hd).transpose(0, 2, 1, 3)
        s = jnp.einsum('nhld,nhmd->nhlm', q, k)
        s = s - jnp.max(s, axis=-1, keepdims=True)
        pr = jnp.exp(s)
        pr = pr / jnp.sum(pr, axis=-1, keepdims=True)
        ctx = jnp.einsum('nhlm,nhmd->nhld', pr, v)
        ctx = ctx.transpose(0, 2, 1, 3).reshape(N, L, D)
        x = x + (ctx @ p["w_out"] + p["b_out"][0])
        y2 = _layernorm(x, p["ln2_g"][0], p["ln2_b"][0])
        h1 = _gelu_tanh(y2 @ p["w_fc"] + p["b_fc"][0])
        x = x + (h1 @ p["w_proj"] + p["b_proj"][0])
    return jnp.transpose(x, (1, 0, 2))


# ----------------------------- main ----------------------------------------------

if __name__ == "__main__":
    # Small shapes consistent with the module: Transformer(width=32, layers=2, heads=4)
    L, N, D, HEADS, LAYERS = 8, 2, 32, 4, 2

    key = jax.random.PRNGKey(0)
    kx, kp = jax.random.split(key)
    x = jax.random.normal(kx, (L, N, D), jnp.float32)   # (seq, batch, width)

    params = make_transformer_params(kp, D, LAYERS)
    kparams = prepare_params(params, HEADS)             # one-time bf16 / scale-fold prep

    try:
        out = jax.block_until_ready(transformer_forward(x, kparams, HEADS, aggressive=True))
    except Exception:
        # Conservative fallback: default double buffering, no io aliasing.
        out = jax.block_until_ready(transformer_forward(x, kparams, HEADS, aggressive=False))

    assert out.shape == (L, N, D)
    assert bool(jnp.all(jnp.isfinite(out)))

    # Loose check against a pure-JAX fp32 reference (kernel uses bf16 MXU operands with
    # fp32 accumulation, a bf16 weight prep, and an approximate softmax reciprocal).
    ref = reference_forward(x, params, HEADS)
    max_err = float(jnp.max(jnp.abs(out - ref)))
    assert max_err < 5e-2, f"max abs error {max_err}"

    print("KERNEL_OK")
</pallas_src>

<mosaic_0001>
module attributes {stable_mosaic.version = 11 : i64} {
  func.func @resblock_kernel(%arg0: i32, %arg1: memref<1x8x32xf32, #tpu.memory_space<vmem>>, %arg2: memref<1x32xf32, #tpu.memory_space<vmem>>, %arg3: memref<1x32xf32, #tpu.memory_space<vmem>>, %arg4: memref<32x96xbf16, #tpu.memory_space<vmem>>, %arg5: memref<1x96xf32, #tpu.memory_space<vmem>>, %arg6: memref<32x32xbf16, #tpu.memory_space<vmem>>, %arg7: memref<1x32xf32, #tpu.memory_space<vmem>>, %arg8: memref<1x32xf32, #tpu.memory_space<vmem>>, %arg9: memref<1x32xf32, #tpu.memory_space<vmem>>, %arg10: memref<32x128xbf16, #tpu.memory_space<vmem>>, %arg11: memref<1x128xf32, #tpu.memory_space<vmem>>, %arg12: memref<128x32xbf16, #tpu.memory_space<vmem>>, %arg13: memref<1x32xf32, #tpu.memory_space<vmem>>, %arg14: memref<1x8x32xf32, #tpu.memory_space<vmem>>) attributes {dimension_semantics = [#tpu.dimension_semantics<parallel>], iteration_bounds = array<i64: 2>, scalar_prefetch = 0 : i64, scratch_operands = 0 : i64, tpu.core_type = #tpu.core_type<tc>, window_params = [{transform_indices = @transform_0, window_bounds = array<i64: 1, 8, 32>}, {pipeline_mode = #tpu.pipeline_mode<synchronous>, transform_indices = @transform_1, window_bounds = array<i64: 1, 32>}, {pipeline_mode = #tpu.pipeline_mode<synchronous>, transform_indices = @transform_2, window_bounds = array<i64: 1, 32>}, {pipeline_mode = #tpu.pipeline_mode<synchronous>, transform_indices = @transform_3, window_bounds = array<i64: 32, 96>}, {pipeline_mode = #tpu.pipeline_mode<synchronous>, transform_indices = @transform_4, window_bounds = array<i64: 1, 96>}, {pipeline_mode = #tpu.pipeline_mode<synchronous>, transform_indices = @transform_5, window_bounds = array<i64: 32, 32>}, {pipeline_mode = #tpu.pipeline_mode<synchronous>, transform_indices = @transform_6, window_bounds = array<i64: 1, 32>}, {pipeline_mode = #tpu.pipeline_mode<synchronous>, transform_indices = @transform_7, window_bounds = array<i64: 1, 32>}, {pipeline_mode = #tpu.pipeline_mode<synchronous>, transform_indices = @transform_8, window_bounds = array<i64: 1, 32>}, {pipeline_mode = #tpu.pipeline_mode<synchronous>, transform_indices = @transform_9, window_bounds = array<i64: 32, 128>}, {pipeline_mode = #tpu.pipeline_mode<synchronous>, transform_indices = @transform_10, window_bounds = array<i64: 1, 128>}, {pipeline_mode = #tpu.pipeline_mode<synchronous>, transform_indices = @transform_11, window_bounds = array<i64: 128, 32>}, {pipeline_mode = #tpu.pipeline_mode<synchronous>, transform_indices = @transform_12, window_bounds = array<i64: 1, 32>}, {transform_indices = @transform_13, window_bounds = array<i64: 1, 8, 32>}]} {
    %c0 = arith.constant 0 : index
    %c0_0 = arith.constant 0 : index
    %c0_1 = arith.constant 0 : index
    %0 = vector.load %arg1[%c0, %c0_0, %c0_1] : memref<1x8x32xf32, #tpu.memory_space<vmem>>, vector<1x8x32xf32>
    %1 = vector.shape_cast %0 : vector<1x8x32xf32> to vector<8x32xf32>
    %c0_2 = arith.constant 0 : index
    %c0_3 = arith.constant 0 : index
    %2 = vector.load %arg2[%c0_2, %c0_3] : memref<1x32xf32, #tpu.memory_space<vmem>>, vector<1x32xf32>
    %3 = vector.shape_cast %2 : vector<1x32xf32> to vector<32xf32>
    %c0_4 = arith.constant 0 : index
    %c0_5 = arith.constant 0 : index
    %4 = vector.load %arg3[%c0_4, %c0_5] : memref<1x32xf32, #tpu.memory_space<vmem>>, vector<1x32xf32>
    %5 = vector.shape_cast %4 : vector<1x32xf32> to vector<32xf32>
    %cst = arith.constant dense<0.000000e+00> : vector<8xf32>
    %6 = vector.multi_reduction <add>, %1, %cst [1] : vector<8x32xf32> to vector<8xf32>
    %7 = vector.shape_cast %6 : vector<8xf32> to vector<8x1xf32>
    %cst_6 = arith.constant 3.200000e+01 : f32
    %8 = vector.broadcast %cst_6 : f32 to vector<8x1xf32>
    %9 = arith.divf %7, %8 : vector<8x1xf32>
    %10 = vector.broadcast %9 : vector<8x1xf32> to vector<8x32xf32>
    %11 = arith.subf %1, %10 : vector<8x32xf32>
    %12 = arith.mulf %11, %11 : vector<8x32xf32>
    %cst_7 = arith.constant dense<0.000000e+00> : vector<8xf32>
    %13 = vector.multi_reduction <add>, %12, %cst_7 [1] : vector<8x32xf32> to vector<8xf32>
    %14 = vector.shape_cast %13 : vector<8xf32> to vector<8x1xf32>
    %cst_8 = arith.constant 3.200000e+01 : f32
    %15 = vector.broadcast %cst_8 : f32 to vector<8x1xf32>
    %16 = arith.divf %14, %15 : vector<8x1xf32>
    %17 = vector.broadcast %9 : vector<8x1xf32> to vector<8x32xf32>
    %18 = arith.subf %1, %17 : vector<8x32xf32>
    %cst_9 = arith.constant 9.99999974E-6 : f32
    %19 = vector.broadcast %cst_9 : f32 to vector<8x1xf32>
    %20 = arith.addf %16, %19 : vector<8x1xf32>
    %21 = math.rsqrt %20 : vector<8x1xf32>
    %22 = vector.broadcast %21 : vector<8x1xf32> to vector<8x32xf32>
    %23 = arith.mulf %18, %22 : vector<8x32xf32>
    %24 = vector.shape_cast %3 : vector<32xf32> to vector<1x32xf32>
    %25 = vector.broadcast %24 : vector<1x32xf32> to vector<8x32xf32>
    %26 = arith.mulf %23, %25 : vector<8x32xf32>
    %27 = vector.shape_cast %5 : vector<32xf32> to vector<1x32xf32>
    %28 = vector.broadcast %27 : vector<1x32xf32> to vector<8x32xf32>
    %29 = arith.addf %26, %28 : vector<8x32xf32>
    %30 = arith.truncf %29 : vector<8x32xf32> to vector<8x32xbf16>
    %c0_10 = arith.constant 0 : index
    %c0_11 = arith.constant 0 : index
    %31 = vector.load %arg4[%c0_10, %c0_11] : memref<32x96xbf16, #tpu.memory_space<vmem>>, vector<32x96xbf16>
    %cst_12 = arith.constant dense<0.000000e+00> : vector<8x96xf32>
    %32 = tpu.matmul %30, %31, %cst_12 {dimension_numbers = #tpu.dot_dimension_numbers<[1], [0], [0], [1], [0, 0, 1, 1], [], []>} : vector<8x32xbf16>, vector<32x96xbf16>, vector<8x96xf32> -> vector<8x96xf32>
    %c0_13 = arith.constant 0 : index
    %c0_14 = arith.constant 0 : index
    %33 = vector.load %arg5[%c0_13, %c0_14] : memref<1x96xf32, #tpu.memory_space<vmem>>, vector<1x96xf32>
    %34 = vector.shape_cast %33 : vector<1x96xf32> to vector<96xf32>
    %35 = vector.shape_cast %34 : vector<96xf32> to vector<1x96xf32>
    %36 = vector.broadcast %35 : vector<1x96xf32> to vector<8x96xf32>
    %37 = arith.addf %32, %36 : vector<8x96xf32>
    %38 = arith.truncf %37 : vector<8x96xf32> to vector<8x96xbf16>
    %39 = vector.shape_cast %38 : vector<8x96xbf16> to vector<1x8x96xbf16>
    %40 = vector.extract_strided_slice %39 {offsets = [0, 0, 0], sizes = [1, 8, 8], strides = [1, 1, 1]} : vector<1x8x96xbf16> to vector<1x8x8xbf16>
    %41 = vector.extract_strided_slice %39 {offsets = [0, 0, 8], sizes = [1, 8, 8], strides = [1, 1, 1]} : vector<1x8x96xbf16> to vector<1x8x8xbf16>
    %42 = vector.extract_strided_slice %39 {offsets = [0, 0, 16], sizes = [1, 8, 8], strides = [1, 1, 1]} : vector<1x8x96xbf16> to vector<1x8x8xbf16>
    %43 = vector.extract_strided_slice %39 {offsets = [0, 0, 24], sizes = [1, 8, 8], strides = [1, 1, 1]} : vector<1x8x96xbf16> to vector<1x8x8xbf16>
    %44 = tpu.concatenate %40, %41, %42, %43 in 0 : vector<1x8x8xbf16>, vector<1x8x8xbf16>, vector<1x8x8xbf16>, vector<1x8x8xbf16> -> vector<4x8x8xbf16>
    %45 = vector.extract_strided_slice %39 {offsets = [0, 0, 32], sizes = [1, 8, 8], strides = [1, 1, 1]} : vector<1x8x96xbf16> to vector<1x8x8xbf16>
    %46 = vector.extract_strided_slice %39 {offsets = [0, 0, 40], sizes = [1, 8, 8], strides = [1, 1, 1]} : vector<1x8x96xbf16> to vector<1x8x8xbf16>
    %47 = vector.extract_strided_slice %39 {offsets = [0, 0, 48], sizes = [1, 8, 8], strides = [1, 1, 1]} : vector<1x8x96xbf16> to vector<1x8x8xbf16>
    %48 = vector.extract_strided_slice %39 {offsets = [0, 0, 56], sizes = [1, 8, 8], strides = [1, 1, 1]} : vector<1x8x96xbf16> to vector<1x8x8xbf16>
    %49 = tpu.concatenate %45, %46, %47, %48 in 0 : vector<1x8x8xbf16>, vector<1x8x8xbf16>, vector<1x8x8xbf16>, vector<1x8x8xbf16> -> vector<4x8x8xbf16>
    %50 = vector.extract_strided_slice %39 {offsets = [0, 0, 64], sizes = [1, 8, 8], strides = [1, 1, 1]} : vector<1x8x96xbf16> to vector<1x8x8xbf16>
    %51 = vector.extract_strided_slice %39 {offsets = [0, 0, 72], sizes = [1, 8, 8], strides = [1, 1, 1]} : vector<1x8x96xbf16> to vector<1x8x8xbf16>
    %52 = vector.extract_strided_slice %39 {offsets = [0, 0, 80], sizes = [1, 8, 8], strides = [1, 1, 1]} : vector<1x8x96xbf16> to vector<1x8x8xbf16>
    %53 = vector.extract_strided_slice %39 {offsets = [0, 0, 88], sizes = [1, 8, 8], strides = [1, 1, 1]} : vector<1x8x96xbf16> to vector<1x8x8xbf16>
    %54 = tpu.concatenate %50, %51, %52, %53 in 0 : vector<1x8x8xbf16>, vector<1x8x8xbf16>, vector<1x8x8xbf16>, vector<1x8x8xbf16> -> vector<4x8x8xbf16>
    "tpu.trace_start"() <{level = 10 : i32, message = "bld,bmd->blm"}> : () -> ()
    %cst_15 = arith.constant dense<0.000000e+00> : vector<4x8x8xf32>
    %55 = tpu.matmul %44, %49, %cst_15 {dimension_numbers = #tpu.dot_dimension_numbers<[2], [2], [1], [1], [0, 0, 0, 1, 1, 1], [0], [0]>} : vector<4x8x8xbf16>, vector<4x8x8xbf16>, vector<4x8x8xf32> -> vector<4x8x8xf32>
    "tpu.trace_stop"() : () -> ()
    %cst_16 = arith.constant dense<0xFF800000> : vector<4x8xf32>
    %56 = vector.multi_reduction <maximumf>, %55, %cst_16 [2] : vector<4x8x8xf32> to vector<4x8xf32>
    %57 = vector.shape_cast %56 : vector<4x8xf32> to vector<4x8x1xf32>
    %58 = vector.broadcast %57 : vector<4x8x1xf32> to vector<4x8x8xf32>
    %59 = arith.subf %55, %58 : vector<4x8x8xf32>
    %60 = math.exp %59 : vector<4x8x8xf32>
    %cst_17 = arith.constant dense<0.000000e+00> : vector<4x8xf32>
    %61 = vector.multi_reduction <add>, %60, %cst_17 [2] : vector<4x8x8xf32> to vector<4x8xf32>
    %62 = vector.shape_cast %61 : vector<4x8xf32> to vector<4x8x1xf32>
    %63 = arith.truncf %60 : vector<4x8x8xf32> to vector<4x8x8xbf16>
    "tpu.trace_start"() <{level = 10 : i32, message = "blm,bmd->bld"}> : () -> ()
    %cst_18 = arith.constant dense<0.000000e+00> : vector<4x8x8xf32>
    %64 = tpu.matmul %63, %54, %cst_18 {dimension_numbers = #tpu.dot_dimension_numbers<[2], [1], [1], [2], [0, 0, 0, 1, 1, 2], [0], [0]>} : vector<4x8x8xbf16>, vector<4x8x8xbf16>, vector<4x8x8xf32> -> vector<4x8x8xf32>
    "tpu.trace_stop"() : () -> ()
    %65 = tpu.reciprocal %62 {approx = true} : vector<4x8x1xf32> -> vector<4x8x1xf32>
    %66 = vector.broadcast %65 : vector<4x8x1xf32> to vector<4x8x8xf32>
    %67 = arith.mulf %64, %66 : vector<4x8x8xf32>
    %68 = arith.truncf %67 : vector<4x8x8xf32> to vector<4x8x8xbf16>
    %69 = vector.shape_cast %68 : vector<4x8x8xbf16> to vector<4x1x8x8xbf16>
    %70 = vector.extract_strided_slice %69 {offsets = [0, 0, 0, 0], sizes = [1, 1, 8, 8], strides = [1, 1, 1, 1]} : vector<4x1x8x8xbf16> to vector<1x1x8x8xbf16>
    %71 = vector.shape_cast %70 : vector<1x1x8x8xbf16> to vector<1x8x8xbf16>
    %72 = vector.extract_strided_slice %69 {offsets = [1, 0, 0, 0], sizes = [1, 1, 8, 8], strides = [1, 1, 1, 1]} : vector<4x1x8x8xbf16> to vector<1x1x8x8xbf16>
    %73 = vector.shape_cast %72 : vector<1x1x8x8xbf16> to vector<1x8x8xbf16>
    %74 = vector.extract_strided_slice %69 {offsets = [2, 0, 0, 0], sizes = [1, 1, 8, 8], strides = [1, 1, 1, 1]} : vector<4x1x8x8xbf16> to vector<1x1x8x8xbf16>
    %75 = vector.shape_cast %74 : vector<1x1x8x8xbf16> to vector<1x8x8xbf16>
    %76 = vector.extract_strided_slice %69 {offsets = [3, 0, 0, 0], sizes = [1, 1, 8, 8], strides = [1, 1, 1, 1]} : vector<4x1x8x8xbf16> to vector<1x1x8x8xbf16>
    %77 = vector.shape_cast %76 : vector<1x1x8x8xbf16> to vector<1x8x8xbf16>
    %78 = tpu.concatenate %71, %73, %75, %77 in 2 : vector<1x8x8xbf16>, vector<1x8x8xbf16>, vector<1x8x8xbf16>, vector<1x8x8xbf16> -> vector<1x8x32xbf16>
    %79 = vector.shape_cast %78 : vector<1x8x32xbf16> to vector<8x32xbf16>
    %c0_19 = arith.constant 0 : index
    %c0_20 = arith.constant 0 : index
    %80 = vector.load %arg6[%c0_19, %c0_20] : memref<32x32xbf16, #tpu.memory_space<vmem>>, vector<32x32xbf16>
    %cst_21 = arith.constant dense<0.000000e+00> : vector<8x32xf32>
    %81 = tpu.matmul %79, %80, %cst_21 {dimension_numbers = #tpu.dot_dimension_numbers<[1], [0], [0], [1], [0, 0, 1, 1], [], []>} : vector<8x32xbf16>, vector<32x32xbf16>, vector<8x32xf32> -> vector<8x32xf32>
    %c0_22 = arith.constant 0 : index
    %c0_23 = arith.constant 0 : index
    %82 = vector.load %arg7[%c0_22, %c0_23] : memref<1x32xf32, #tpu.memory_space<vmem>>, vector<1x32xf32>
    %83 = vector.shape_cast %82 : vector<1x32xf32> to vector<32xf32>
    %84 = vector.shape_cast %83 : vector<32xf32> to vector<1x32xf32>
    %85 = vector.broadcast %84 : vector<1x32xf32> to vector<8x32xf32>
    %86 = arith.addf %81, %85 : vector<8x32xf32>
    %87 = arith.addf %1, %86 : vector<8x32xf32>
    %c0_24 = arith.constant 0 : index
    %c0_25 = arith.constant 0 : index
    %88 = vector.load %arg8[%c0_24, %c0_25] : memref<1x32xf32, #tpu.memory_space<vmem>>, vector<1x32xf32>
    %89 = vector.shape_cast %88 : vector<1x32xf32> to vector<32xf32>
    %c0_26 = arith.constant 0 : index
    %c0_27 = arith.constant 0 : index
    %90 = vector.load %arg9[%c0_26, %c0_27] : memref<1x32xf32, #tpu.memory_space<vmem>>, vector<1x32xf32>
    %91 = vector.shape_cast %90 : vector<1x32xf32> to vector<32xf32>
    %cst_28 = arith.constant dense<0.000000e+00> : vector<8xf32>
    %92 = vector.multi_reduction <add>, %87, %cst_28 [1] : vector<8x32xf32> to vector<8xf32>
    %93 = vector.shape_cast %92 : vector<8xf32> to vector<8x1xf32>
    %cst_29 = arith.constant 3.200000e+01 : f32
    %94 = vector.broadcast %cst_29 : f32 to vector<8x1xf32>
    %95 = arith.divf %93, %94 : vector<8x1xf32>
    %96 = vector.broadcast %95 : vector<8x1xf32> to vector<8x32xf32>
    %97 = arith.subf %87, %96 : vector<8x32xf32>
    %98 = arith.mulf %97, %97 : vector<8x32xf32>
    %cst_30 = arith.constant dense<0.000000e+00> : vector<8xf32>
    %99 = vector.multi_reduction <add>, %98, %cst_30 [1] : vector<8x32xf32> to vector<8xf32>
    %100 = vector.shape_cast %99 : vector<8xf32> to vector<8x1xf32>
    %cst_31 = arith.constant 3.200000e+01 : f32
    %101 = vector.broadcast %cst_31 : f32 to vector<8x1xf32>
    %102 = arith.divf %100, %101 : vector<8x1xf32>
    %103 = vector.broadcast %95 : vector<8x1xf32> to vector<8x32xf32>
    %104 = arith.subf %87, %103 : vector<8x32xf32>
    %cst_32 = arith.constant 9.99999974E-6 : f32
    %105 = vector.broadcast %cst_32 : f32 to vector<8x1xf32>
    %106 = arith.addf %102, %105 : vector<8x1xf32>
    %107 = math.rsqrt %106 : vector<8x1xf32>
    %108 = vector.broadcast %107 : vector<8x1xf32> to vector<8x32xf32>
    %109 = arith.mulf %104, %108 : vector<8x32xf32>
    %110 = vector.shape_cast %89 : vector<32xf32> to vector<1x32xf32>
    %111 = vector.broadcast %110 : vector<1x32xf32> to vector<8x32xf32>
    %112 = arith.mulf %109, %111 : vector<8x32xf32>
    %113 = vector.shape_cast %91 : vector<32xf32> to vector<1x32xf32>
    %114 = vector.broadcast %113 : vector<1x32xf32> to vector<8x32xf32>
    %115 = arith.addf %112, %114 : vector<8x32xf32>
    %116 = arith.truncf %115 : vector<8x32xf32> to vector<8x32xbf16>
    %c0_33 = arith.constant 0 : index
    %c0_34 = arith.constant 0 : index
    %117 = vector.load %arg10[%c0_33, %c0_34] : memref<32x128xbf16, #tpu.memory_space<vmem>>, vector<32x128xbf16>
    %cst_35 = arith.constant dense<0.000000e+00> : vector<8x128xf32>
    %118 = tpu.matmul %116, %117, %cst_35 {dimension_numbers = #tpu.dot_dimension_numbers<[1], [0], [0], [1], [0, 0, 1, 1], [], []>} : vector<8x32xbf16>, vector<32x128xbf16>, vector<8x128xf32> -> vector<8x128xf32>
    %c0_36 = arith.constant 0 : index
    %c0_37 = arith.constant 0 : index
    %119 = vector.load %arg11[%c0_36, %c0_37] : memref<1x128xf32, #tpu.memory_space<vmem>>, vector<1x128xf32>
    %120 = vector.shape_cast %119 : vector<1x128xf32> to vector<128xf32>
    %121 = vector.shape_cast %120 : vector<128xf32> to vector<1x128xf32>
    %122 = vector.broadcast %121 : vector<1x128xf32> to vector<8x128xf32>
    %123 = arith.addf %118, %122 : vector<8x128xf32>
    %cst_38 = arith.constant 5.000000e-01 : f32
    %124 = vector.broadcast %cst_38 : f32 to vector<8x128xf32>
    %125 = arith.mulf %124, %123 : vector<8x128xf32>
    %cst_39 = arith.constant 4.471500e-02 : f32
    %126 = vector.broadcast %cst_39 : f32 to vector<8x128xf32>
    %127 = arith.mulf %126, %123 : vector<8x128xf32>
    %128 = arith.mulf %127, %123 : vector<8x128xf32>
    %129 = arith.mulf %128, %123 : vector<8x128xf32>
    %130 = arith.addf %123, %129 : vector<8x128xf32>
    %cst_40 = arith.constant 0.797884583 : f32
    %131 = vector.broadcast %cst_40 : f32 to vector<8x128xf32>
    %132 = arith.mulf %131, %130 : vector<8x128xf32>
    %133 = math.tanh %132 : vector<8x128xf32>
    %cst_41 = arith.constant 1.000000e+00 : f32
    %134 = vector.broadcast %cst_41 : f32 to vector<8x128xf32>
    %135 = arith.addf %134, %133 : vector<8x128xf32>
    %136 = arith.mulf %125, %135 : vector<8x128xf32>
    %137 = arith.truncf %136 : vector<8x128xf32> to vector<8x128xbf16>
    %c0_42 = arith.constant 0 : index
    %c0_43 = arith.constant 0 : index
    %138 = vector.load %arg12[%c0_42, %c0_43] : memref<128x32xbf16, #tpu.memory_space<vmem>>, vector<128x32xbf16>
    %cst_44 = arith.constant dense<0.000000e+00> : vector<8x32xf32>
    %139 = tpu.matmul %137, %138, %cst_44 {dimension_numbers = #tpu.dot_dimension_numbers<[1], [0], [0], [1], [0, 0, 1, 1], [], []>} : vector<8x128xbf16>, vector<128x32xbf16>, vector<8x32xf32> -> vector<8x32xf32>
    %c0_45 = arith.constant 0 : index
    %c0_46 = arith.constant 0 : index
    %140 = vector.load %arg13[%c0_45, %c0_46] : memref<1x32xf32, #tpu.memory_space<vmem>>, vector<1x32xf32>
    %141 = vector.shape_cast %140 : vector<1x32xf32> to vector<32xf32>
    %142 = vector.shape_cast %141 : vector<32xf32> to vector<1x32xf32>
    %143 = vector.broadcast %142 : vector<1x32xf32> to vector<8x32xf32>
    %144 = arith.addf %139, %143 : vector<8x32xf32>
    %145 = arith.addf %87, %144 : vector<8x32xf32>
    %146 = vector.shape_cast %145 : vector<8x32xf32> to vector<1x8x32xf32>
    %c0_47 = arith.constant 0 : index
    %c0_48 = arith.constant 0 : index
    %c0_49 = arith.constant 0 : index
    %147 = vector.load %arg14[%c0_47, %c0_48, %c0_49] : memref<1x8x32xf32, #tpu.memory_space<vmem>>, vector<1x8x32xf32>
    tpu.vector_store %arg14[%c0_47, %c0_48, %c0_49], %146 {strides = array<i32>} : memref<1x8x32xf32, #tpu.memory_space<vmem>>, vector<1x8x32xf32>,
    return
  }
  func.func @transform_0(%arg0: i32) -> (i32, i32, i32) {
    %c0_i32 = arith.constant 0 : i32
    %c0_i32_0 = arith.constant 0 : i32
    %c0_i32_1 = arith.constant 0 : i32
    return %arg0, %c0_i32, %c0_i32_0 : i32, i32, i32
  }
  func.func @transform_1(%arg0: i32) -> (i32, i32) {
    %c0_i32 = arith.constant 0 : i32
    %c0_i32_0 = arith.constant 0 : i32
    %c0_i32_1 = arith.constant 0 : i32
    return %c0_i32, %c0_i32_0 : i32, i32
  }
  func.func @transform_2(%arg0: i32) -> (i32, i32) {
    %c0_i32 = arith.constant 0 : i32
    %c0_i32_0 = arith.constant 0 : i32
    %c0_i32_1 = arith.constant 0 : i32
    return %c0_i32, %c0_i32_0 : i32, i32
  }
  func.func @transform_3(%arg0: i32) -> (i32, i32) {
    %c0_i32 = arith.constant 0 : i32
    %c0_i32_0 = arith.constant 0 : i32
    %c0_i32_1 = arith.constant 0 : i32
    return %c0_i32, %c0_i32_0 : i32, i32
  }
  func.func @transform_4(%arg0: i32) -> (i32, i32) {
    %c0_i32 = arith.constant 0 : i32
    %c0_i32_0 = arith.constant 0 : i32
    %c0_i32_1 = arith.constant 0 : i32
    return %c0_i32, %c0_i32_0 : i32, i32
  }
  func.func @transform_5(%arg0: i32) -> (i32, i32) {
    %c0_i32 = arith.constant 0 : i32
    %c0_i32_0 = arith.constant 0 : i32
    %c0_i32_1 = arith.constant 0 : i32
    return %c0_i32, %c0_i32_0 : i32, i32
  }
  func.func @transform_6(%arg0: i32) -> (i32, i32) {
    %c0_i32 = arith.constant 0 : i32
    %c0_i32_0 = arith.constant 0 : i32
    %c0_i32_1 = arith.constant 0 : i32
    return %c0_i32, %c0_i32_0 : i32, i32
  }
  func.func @transform_7(%arg0: i32) -> (i32, i32) {
    %c0_i32 = arith.constant 0 : i32
    %c0_i32_0 = arith.constant 0 : i32
    %c0_i32_1 = arith.constant 0 : i32
    return %c0_i32, %c0_i32_0 : i32, i32
  }
  func.func @transform_8(%arg0: i32) -> (i32, i32) {
    %c0_i32 = arith.constant 0 : i32
    %c0_i32_0 = arith.constant 0 : i32
    %c0_i32_1 = arith.constant 0 : i32
    return %c0_i32, %c0_i32_0 : i32, i32
  }
  func.func @transform_9(%arg0: i32) -> (i32, i32) {
    %c0_i32 = arith.constant 0 : i32
    %c0_i32_0 = arith.constant 0 : i32
    %c0_i32_1 = arith.constant 0 : i32
    return %c0_i32, %c0_i32_0 : i32, i32
  }
  func.func @transform_10(%arg0: i32) -> (i32, i32) {
    %c0_i32 = arith.constant 0 : i32
    %c0_i32_0 = arith.constant 0 : i32
    %c0_i32_1 = arith.constant 0 : i32
    return %c0_i32, %c0_i32_0 : i32, i32
  }
  func.func @transform_11(%arg0: i32) -> (i32, i32) {
    %c0_i32 = arith.constant 0 : i32
    %c0_i32_0 = arith.constant 0 : i32
    %c0_i32_1 = arith.constant 0 : i32
    return %c0_i32, %c0_i32_0 : i32, i32
  }
  func.func @transform_12(%arg0: i32) -> (i32, i32) {
    %c0_i32 = arith.constant 0 : i32
    %c0_i32_0 = arith.constant 0 : i32
    %c0_i32_1 = arith.constant 0 : i32
    return %c0_i32, %c0_i32_0 : i32, i32
  }
  func.func @transform_13(%arg0: i32) -> (i32, i32, i32) {
    %c0_i32 = arith.constant 0 : i32
    %c0_i32_0 = arith.constant 0 : i32
    %c0_i32_1 = arith.constant 0 : i32
    return %arg0, %c0_i32, %c0_i32_0 : i32, i32, i32
  }
}

module attributes {stable_mosaic.version = 11 : i64} {
  func.func @resblock_kernel(%arg0: i32, %arg1: memref<1x8x32xf32, #tpu.memory_space<vmem>>, %arg2: memref<1x32xf32, #tpu.memory_space<vmem>>, %arg3: memref<1x32xf32, #tpu.memory_space<vmem>>, %arg4: memref<32x96xbf16, #tpu.memory_space<vmem>>, %arg5: memref<1x96xf32, #tpu.memory_space<vmem>>, %arg6: memref<32x32xbf16, #tpu.memory_space<vmem>>, %arg7: memref<1x32xf32, #tpu.memory_space<vmem>>, %arg8: memref<1x32xf32, #tpu.memory_space<vmem>>, %arg9: memref<1x32xf32, #tpu.memory_space<vmem>>, %arg10: memref<32x128xbf16, #tpu.memory_space<vmem>>, %arg11: memref<1x128xf32, #tpu.memory_space<vmem>>, %arg12: memref<128x32xbf16, #tpu.memory_space<vmem>>, %arg13: memref<1x32xf32, #tpu.memory_space<vmem>>, %arg14: memref<1x8x32xf32, #tpu.memory_space<vmem>>) attributes {dimension_semantics = [#tpu.dimension_semantics<parallel>], iteration_bounds = array<i64: 2>, scalar_prefetch = 0 : i64, scratch_operands = 0 : i64, tpu.core_type = #tpu.core_type<tc>, window_params = [{transform_indices = @transform_0, window_bounds = array<i64: 1, 8, 32>}, {pipeline_mode = #tpu.pipeline_mode<synchronous>, transform_indices = @transform_1, window_bounds = array<i64: 1, 32>}, {pipeline_mode = #tpu.pipeline_mode<synchronous>, transform_indices = @transform_2, window_bounds = array<i64: 1, 32>}, {pipeline_mode = #tpu.pipeline_mode<synchronous>, transform_indices = @transform_3, window_bounds = array<i64: 32, 96>}, {pipeline_mode = #tpu.pipeline_mode<synchronous>, transform_indices = @transform_4, window_bounds = array<i64: 1, 96>}, {pipeline_mode = #tpu.pipeline_mode<synchronous>, transform_indices = @transform_5, window_bounds = array<i64: 32, 32>}, {pipeline_mode = #tpu.pipeline_mode<synchronous>, transform_indices = @transform_6, window_bounds = array<i64: 1, 32>}, {pipeline_mode = #tpu.pipeline_mode<synchronous>, transform_indices = @transform_7, window_bounds = array<i64: 1, 32>}, {pipeline_mode = #tpu.pipeline_mode<synchronous>, transform_indices = @transform_8, window_bounds = array<i64: 1, 32>}, {pipeline_mode = #tpu.pipeline_mode<synchronous>, transform_indices = @transform_9, window_bounds = array<i64: 32, 128>}, {pipeline_mode = #tpu.pipeline_mode<synchronous>, transform_indices = @transform_10, window_bounds = array<i64: 1, 128>}, {pipeline_mode = #tpu.pipeline_mode<synchronous>, transform_indices = @transform_11, window_bounds = array<i64: 128, 32>}, {pipeline_mode = #tpu.pipeline_mode<synchronous>, transform_indices = @transform_12, window_bounds = array<i64: 1, 32>}, {transform_indices = @transform_13, window_bounds = array<i64: 1, 8, 32>}]} {
    %c0 = arith.constant 0 : index
    %c0_0 = arith.constant 0 : index
    %c0_1 = arith.constant 0 : index
    %0 = vector.load %arg1[%c0, %c0_0, %c0_1] : memref<1x8x32xf32, #tpu.memory_space<vmem>>, vector<1x8x32xf32>
    %1 = vector.shape_cast %0 : vector<1x8x32xf32> to vector<8x32xf32>
    %c0_2 = arith.constant 0 : index
    %c0_3 = arith.constant 0 : index
    %2 = vector.load %arg2[%c0_2, %c0_3] : memref<1x32xf32, #tpu.memory_space<vmem>>, vector<1x32xf32>
    %3 = vector.shape_cast %2 : vector<1x32xf32> to vector<32xf32>
    %c0_4 = arith.constant 0 : index
    %c0_5 = arith.constant 0 : index
    %4 = vector.load %arg3[%c0_4, %c0_5] : memref<1x32xf32, #tpu.memory_space<vmem>>, vector<1x32xf32>
    %5 = vector.shape_cast %4 : vector<1x32xf32> to vector<32xf32>
    %cst = arith.constant dense<0.000000e+00> : vector<8xf32>
    %6 = vector.multi_reduction <add>, %1, %cst [1] : vector<8x32xf32> to vector<8xf32>
    %7 = vector.shape_cast %6 : vector<8xf32> to vector<8x1xf32>
    %cst_6 = arith.constant 3.200000e+01 : f32
    %8 = vector.broadcast %cst_6 : f32 to vector<8x1xf32>
    %9 = arith.divf %7, %8 : vector<8x1xf32>
    %10 = vector.broadcast %9 : vector<8x1xf32> to vector<8x32xf32>
    %11 = arith.subf %1, %10 : vector<8x32xf32>
    %12 = arith.mulf %11, %11 : vector<8x32xf32>
    %cst_7 = arith.constant dense<0.000000e+00> : vector<8xf32>
    %13 = vector.multi_reduction <add>, %12, %cst_7 [1] : vector<8x32xf32> to vector<8xf32>
    %14 = vector.shape_cast %13 : vector<8xf32> to vector<8x1xf32>
    %cst_8 = arith.constant 3.200000e+01 : f32
    %15 = vector.broadcast %cst_8 : f32 to vector<8x1xf32>
    %16 = arith.divf %14, %15 : vector<8x1xf32>
    %17 = vector.broadcast %9 : vector<8x1xf32> to vector<8x32xf32>
    %18 = arith.subf %1, %17 : vector<8x32xf32>
    %cst_9 = arith.constant 9.99999974E-6 : f32
    %19 = vector.broadcast %cst_9 : f32 to vector<8x1xf32>
    %20 = arith.addf %16, %19 : vector<8x1xf32>
    %21 = math.rsqrt %20 : vector<8x1xf32>
    %22 = vector.broadcast %21 : vector<8x1xf32> to vector<8x32xf32>
    %23 = arith.mulf %18, %22 : vector<8x32xf32>
    %24 = vector.shape_cast %3 : vector<32xf32> to vector<1x32xf32>
    %25 = vector.broadcast %24 : vector<1x32xf32> to vector<8x32xf32>
    %26 = arith.mulf %23, %25 : vector<8x32xf32>
    %27 = vector.shape_cast %5 : vector<32xf32> to vector<1x32xf32>
    %28 = vector.broadcast %27 : vector<1x32xf32> to vector<8x32xf32>
    %29 = arith.addf %26, %28 : vector<8x32xf32>
    %30 = arith.truncf %29 : vector<8x32xf32> to vector<8x32xbf16>
    %c0_10 = arith.constant 0 : index
    %c0_11 = arith.constant 0 : index
    %31 = vector.load %arg4[%c0_10, %c0_11] : memref<32x96xbf16, #tpu.memory_space<vmem>>, vector<32x96xbf16>
    %cst_12 = arith.constant dense<0.000000e+00> : vector<8x96xf32>
    %32 = tpu.matmul %30, %31, %cst_12 {dimension_numbers = #tpu.dot_dimension_numbers<[1], [0], [0], [1], [0, 0, 1, 1], [], []>} : vector<8x32xbf16>, vector<32x96xbf16>, vector<8x96xf32> -> vector<8x96xf32>
    %c0_13 = arith.constant 0 : index
    %c0_14 = arith.constant 0 : index
    %33 = vector.load %arg5[%c0_13, %c0_14] : memref<1x96xf32, #tpu.memory_space<vmem>>, vector<1x96xf32>
    %34 = vector.shape_cast %33 : vector<1x96xf32> to vector<96xf32>
    %35 = vector.shape_cast %34 : vector<96xf32> to vector<1x96xf32>
    %36 = vector.broadcast %35 : vector<1x96xf32> to vector<8x96xf32>
    %37 = arith.addf %32, %36 : vector<8x96xf32>
    %38 = arith.truncf %37 : vector<8x96xf32> to vector<8x96xbf16>
    %39 = vector.shape_cast %38 : vector<8x96xbf16> to vector<1x8x96xbf16>
    %40 = vector.extract_strided_slice %39 {offsets = [0, 0, 0], sizes = [1, 8, 8], strides = [1, 1, 1]} : vector<1x8x96xbf16> to vector<1x8x8xbf16>
    %41 = vector.extract_strided_slice %39 {offsets = [0, 0, 8], sizes = [1, 8, 8], strides = [1, 1, 1]} : vector<1x8x96xbf16> to vector<1x8x8xbf16>
    %42 = vector.extract_strided_slice %39 {offsets = [0, 0, 16], sizes = [1, 8, 8], strides = [1, 1, 1]} : vector<1x8x96xbf16> to vector<1x8x8xbf16>
    %43 = vector.extract_strided_slice %39 {offsets = [0, 0, 24], sizes = [1, 8, 8], strides = [1, 1, 1]} : vector<1x8x96xbf16> to vector<1x8x8xbf16>
    %44 = tpu.concatenate %40, %41, %42, %43 in 0 : vector<1x8x8xbf16>, vector<1x8x8xbf16>, vector<1x8x8xbf16>, vector<1x8x8xbf16> -> vector<4x8x8xbf16>
    %45 = vector.extract_strided_slice %39 {offsets = [0, 0, 32], sizes = [1, 8, 8], strides = [1, 1, 1]} : vector<1x8x96xbf16> to vector<1x8x8xbf16>
    %46 = vector.extract_strided_slice %39 {offsets = [0, 0, 40], sizes = [1, 8, 8], strides = [1, 1, 1]} : vector<1x8x96xbf16> to vector<1x8x8xbf16>
    %47 = vector.extract_strided_slice %39 {offsets = [0, 0, 48], sizes = [1, 8, 8], strides = [1, 1, 1]} : vector<1x8x96xbf16> to vector<1x8x8xbf16>
    %48 = vector.extract_strided_slice %39 {offsets = [0, 0, 56], sizes = [1, 8, 8], strides = [1, 1, 1]} : vector<1x8x96xbf16> to vector<1x8x8xbf16>
    %49 = tpu.concatenate %45, %46, %47, %48 in 0 : vector<1x8x8xbf16>, vector<1x8x8xbf16>, vector<1x8x8xbf16>, vector<1x8x8xbf16> -> vector<4x8x8xbf16>
    %50 = vector.extract_strided_slice %39 {offsets = [0, 0, 64], sizes = [1, 8, 8], strides = [1, 1, 1]} : vector<1x8x96xbf16> to vector<1x8x8xbf16>
    %51 = vector.extract_strided_slice %39 {offsets = [0, 0, 72], sizes = [1, 8, 8], strides = [1, 1, 1]} : vector<1x8x96xbf16> to vector<1x8x8xbf16>
    %52 = vector.extract_strided_slice %39 {offsets = [0, 0, 80], sizes = [1, 8, 8], strides = [1, 1, 1]} : vector<1x8x96xbf16> to vector<1x8x8xbf16>
    %53 = vector.extract_strided_slice %39 {offsets = [0, 0, 88], sizes = [1, 8, 8], strides = [1, 1, 1]} : vector<1x8x96xbf16> to vector<1x8x8xbf16>
    %54 = tpu.concatenate %50, %51, %52, %53 in 0 : vector<1x8x8xbf16>, vector<1x8x8xbf16>, vector<1x8x8xbf16>, vector<1x8x8xbf16> -> vector<4x8x8xbf16>
    "tpu.trace_start"() <{level = 10 : i32, message = "bld,bmd->blm"}> : () -> ()
    %cst_15 = arith.constant dense<0.000000e+00> : vector<4x8x8xf32>
    %55 = tpu.matmul %44, %49, %cst_15 {dimension_numbers = #tpu.dot_dimension_numbers<[2], [2], [1], [1], [0, 0, 0, 1, 1, 1], [0], [0]>} : vector<4x8x8xbf16>, vector<4x8x8xbf16>, vector<4x8x8xf32> -> vector<4x8x8xf32>
    "tpu.trace_stop"() : () -> ()
    %cst_16 = arith.constant dense<0xFF800000> : vector<4x8xf32>
    %56 = vector.multi_reduction <maximumf>, %55, %cst_16 [2] : vector<4x8x8xf32> to vector<4x8xf32>
    %57 = vector.shape_cast %56 : vector<4x8xf32> to vector<4x8x1xf32>
    %58 = vector.broadcast %57 : vector<4x8x1xf32> to vector<4x8x8xf32>
    %59 = arith.subf %55, %58 : vector<4x8x8xf32>
    %60 = math.exp %59 : vector<4x8x8xf32>
    %cst_17 = arith.constant dense<0.000000e+00> : vector<4x8xf32>
    %61 = vector.multi_reduction <add>, %60, %cst_17 [2] : vector<4x8x8xf32> to vector<4x8xf32>
    %62 = vector.shape_cast %61 : vector<4x8xf32> to vector<4x8x1xf32>
    %63 = arith.truncf %60 : vector<4x8x8xf32> to vector<4x8x8xbf16>
    "tpu.trace_start"() <{level = 10 : i32, message = "blm,bmd->bld"}> : () -> ()
    %cst_18 = arith.constant dense<0.000000e+00> : vector<4x8x8xf32>
    %64 = tpu.matmul %63, %54, %cst_18 {dimension_numbers = #tpu.dot_dimension_numbers<[2], [1], [1], [2], [0, 0, 0, 1, 1, 2], [0], [0]>} : vector<4x8x8xbf16>, vector<4x8x8xbf16>, vector<4x8x8xf32> -> vector<4x8x8xf32>
    "tpu.trace_stop"() : () -> ()
    %65 = tpu.reciprocal %62 {approx = true} : vector<4x8x1xf32> -> vector<4x8x1xf32>
    %66 = vector.broadcast %65 : vector<4x8x1xf32> to vector<4x8x8xf32>
    %67 = arith.mulf %64, %66 : vector<4x8x8xf32>
    %68 = arith.truncf %67 : vector<4x8x8xf32> to vector<4x8x8xbf16>
    %69 = vector.shape_cast %68 : vector<4x8x8xbf16> to vector<4x1x8x8xbf16>
    %70 = vector.extract_strided_slice %69 {offsets = [0, 0, 0, 0], sizes = [1, 1, 8, 8], strides = [1, 1, 1, 1]} : vector<4x1x8x8xbf16> to vector<1x1x8x8xbf16>
    %71 = vector.shape_cast %70 : vector<1x1x8x8xbf16> to vector<1x8x8xbf16>
    %72 = vector.extract_strided_slice %69 {offsets = [1, 0, 0, 0], sizes = [1, 1, 8, 8], strides = [1, 1, 1, 1]} : vector<4x1x8x8xbf16> to vector<1x1x8x8xbf16>
    %73 = vector.shape_cast %72 : vector<1x1x8x8xbf16> to vector<1x8x8xbf16>
    %74 = vector.extract_strided_slice %69 {offsets = [2, 0, 0, 0], sizes = [1, 1, 8, 8], strides = [1, 1, 1, 1]} : vector<4x1x8x8xbf16> to vector<1x1x8x8xbf16>
    %75 = vector.shape_cast %74 : vector<1x1x8x8xbf16> to vector<1x8x8xbf16>
    %76 = vector.extract_strided_slice %69 {offsets = [3, 0, 0, 0], sizes = [1, 1, 8, 8], strides = [1, 1, 1, 1]} : vector<4x1x8x8xbf16> to vector<1x1x8x8xbf16>
    %77 = vector.shape_cast %76 : vector<1x1x8x8xbf16> to vector<1x8x8xbf16>
    %78 = tpu.concatenate %71, %73, %75, %77 in 2 : vector<1x8x8xbf16>, vector<1x8x8xbf16>, vector<1x8x8xbf16>, vector<1x8x8xbf16> -> vector<1x8x32xbf16>
    %79 = vector.shape_cast %78 : vector<1x8x32xbf16> to vector<8x32xbf16>
    %c0_19 = arith.constant 0 : index
    %c0_20 = arith.constant 0 : index
    %80 = vector.load %arg6[%c0_19, %c0_20] : memref<32x32xbf16, #tpu.memory_space<vmem>>, vector<32x32xbf16>
    %cst_21 = arith.constant dense<0.000000e+00> : vector<8x32xf32>
    %81 = tpu.matmul %79, %80, %cst_21 {dimension_numbers = #tpu.dot_dimension_numbers<[1], [0], [0], [1], [0, 0, 1, 1], [], []>} : vector<8x32xbf16>, vector<32x32xbf16>, vector<8x32xf32> -> vector<8x32xf32>
    %c0_22 = arith.constant 0 : index
    %c0_23 = arith.constant 0 : index
    %82 = vector.load %arg7[%c0_22, %c0_23] : memref<1x32xf32, #tpu.memory_space<vmem>>, vector<1x32xf32>
    %83 = vector.shape_cast %82 : vector<1x32xf32> to vector<32xf32>
    %84 = vector.shape_cast %83 : vector<32xf32> to vector<1x32xf32>
    %85 = vector.broadcast %84 : vector<1x32xf32> to vector<8x32xf32>
    %86 = arith.addf %81, %85 : vector<8x32xf32>
    %87 = arith.addf %1, %86 : vector<8x32xf32>
    %c0_24 = arith.constant 0 : index
    %c0_25 = arith.constant 0 : index
    %88 = vector.load %arg8[%c0_24, %c0_25] : memref<1x32xf32, #tpu.memory_space<vmem>>, vector<1x32xf32>
    %89 = vector.shape_cast %88 : vector<1x32xf32> to vector<32xf32>
    %c0_26 = arith.constant 0 : index
    %c0_27 = arith.constant 0 : index
    %90 = vector.load %arg9[%c0_26, %c0_27] : memref<1x32xf32, #tpu.memory_space<vmem>>, vector<1x32xf32>
    %91 = vector.shape_cast %90 : vector<1x32xf32> to vector<32xf32>
    %cst_28 = arith.constant dense<0.000000e+00> : vector<8xf32>
    %92 = vector.multi_reduction <add>, %87, %cst_28 [1] : vector<8x32xf32> to vector<8xf32>
    %93 = vector.shape_cast %92 : vector<8xf32> to vector<8x1xf32>
    %cst_29 = arith.constant 3.200000e+01 : f32
    %94 = vector.broadcast %cst_29 : f32 to vector<8x1xf32>
    %95 = arith.divf %93, %94 : vector<8x1xf32>
    %96 = vector.broadcast %95 : vector<8x1xf32> to vector<8x32xf32>
    %97 = arith.subf %87, %96 : vector<8x32xf32>
    %98 = arith.mulf %97, %97 : vector<8x32xf32>
    %cst_30 = arith.constant dense<0.000000e+00> : vector<8xf32>
    %99 = vector.multi_reduction <add>, %98, %cst_30 [1] : vector<8x32xf32> to vector<8xf32>
    %100 = vector.shape_cast %99 : vector<8xf32> to vector<8x1xf32>
    %cst_31 = arith.constant 3.200000e+01 : f32
    %101 = vector.broadcast %cst_31 : f32 to vector<8x1xf32>
    %102 = arith.divf %100, %101 : vector<8x1xf32>
    %103 = vector.broadcast %95 : vector<8x1xf32> to vector<8x32xf32>
    %104 = arith.subf %87, %103 : vector<8x32xf32>
    %cst_32 = arith.constant 9.99999974E-6 : f32
    %105 = vector.broadcast %cst_32 : f32 to vector<8x1xf32>
    %106 = arith.addf %102, %105 : vector<8x1xf32>
    %107 = math.rsqrt %106 : vector<8x1xf32>
    %108 = vector.broadcast %107 : vector<8x1xf32> to vector<8x32xf32>
    %109 = arith.mulf %104, %108 : vector<8x32xf32>
    %110 = vector.shape_cast %89 : vector<32xf32> to vector<1x32xf32>
    %111 = vector.broadcast %110 : vector<1x32xf32> to vector<8x32xf32>
    %112 = arith.mulf %109, %111 : vector<8x32xf32>
    %113 = vector.shape_cast %91 : vector<32xf32> to vector<1x32xf32>
    %114 = vector.broadcast %113 : vector<1x32xf32> to vector<8x32xf32>
    %115 = arith.addf %112, %114 : vector<8x32xf32>
    %116 = arith.truncf %115 : vector<8x32xf32> to vector<8x32xbf16>
    %c0_33 = arith.constant 0 : index
    %c0_34 = arith.constant 0 : index
    %117 = vector.load %arg10[%c0_33, %c0_34] : memref<32x128xbf16, #tpu.memory_space<vmem>>, vector<32x128xbf16>
    %cst_35 = arith.constant dense<0.000000e+00> : vector<8x128xf32>
    %118 = tpu.matmul %116, %117, %cst_35 {dimension_numbers = #tpu.dot_dimension_numbers<[1], [0], [0], [1], [0, 0, 1, 1], [], []>} : vector<8x32xbf16>, vector<32x128xbf16>, vector<8x128xf32> -> vector<8x128xf32>
    %c0_36 = arith.constant 0 : index
    %c0_37 = arith.constant 0 : index
    %119 = vector.load %arg11[%c0_36, %c0_37] : memref<1x128xf32, #tpu.memory_space<vmem>>, vector<1x128xf32>
    %120 = vector.shape_cast %119 : vector<1x128xf32> to vector<128xf32>
    %121 = vector.shape_cast %120 : vector<128xf32> to vector<1x128xf32>
    %122 = vector.broadcast %121 : vector<1x128xf32> to vector<8x128xf32>
    %123 = arith.addf %118, %122 : vector<8x128xf32>
    %cst_38 = arith.constant 5.000000e-01 : f32
    %124 = vector.broadcast %cst_38 : f32 to vector<8x128xf32>
    %125 = arith.mulf %124, %123 : vector<8x128xf32>
    %cst_39 = arith.constant 4.471500e-02 : f32
    %126 = vector.broadcast %cst_39 : f32 to vector<8x128xf32>
    %127 = arith.mulf %126, %123 : vector<8x128xf32>
    %128 = arith.mulf %127, %123 : vector<8x128xf32>
    %129 = arith.mulf %128, %123 : vector<8x128xf32>
    %130 = arith.addf %123, %129 : vector<8x128xf32>
    %cst_40 = arith.constant 0.797884583 : f32
    %131 = vector.broadcast %cst_40 : f32 to vector<8x128xf32>
    %132 = arith.mulf %131, %130 : vector<8x128xf32>
    %133 = math.tanh %132 : vector<8x128xf32>
    %cst_41 = arith.constant 1.000000e+00 : f32
    %134 = vector.broadcast %cst_41 : f32 to vector<8x128xf32>
    %135 = arith.addf %134, %133 : vector<8x128xf32>
    %136 = arith.mulf %125, %135 : vector<8x128xf32>
    %137 = arith.truncf %136 : vector<8x128xf32> to vector<8x128xbf16>
    %c0_42 = arith.constant 0 : index
    %c0_43 = arith.constant 0 : index
    %138 = vector.load %arg12[%c0_42, %c0_43] : memref<128x32xbf16, #tpu.memory_space<vmem>>, vector<128x32xbf16>
    %cst_44 = arith.constant dense<0.000000e+00> : vector<8x32xf32>
    %139 = tpu.matmul %137, %138, %cst_44 {dimension_numbers = #tpu.dot_dimension_numbers<[1], [0], [0], [1], [0, 0, 1, 1], [], []>} : vector<8x128xbf16>, vector<128x32xbf16>, vector<8x32xf32> -> vector<8x32xf32>
    %c0_45 = arith.constant 0 : index
    %c0_46 = arith.constant 0 : index
    %140 = vector.load %arg13[%c0_45, %c0_46] : memref<1x32xf32, #tpu.memory_space<vmem>>, vector<1x32xf32>
    %141 = vector.shape_cast %140 : vector<1x32xf32> to vector<32xf32>
    %142 = vector.shape_cast %141 : vector<32xf32> to vector<1x32xf32>
    %143 = vector.broadcast %142 : vector<1x32xf32> to vector<8x32xf32>
    %144 = arith.addf %139, %143 : vector<8x32xf32>
    %145 = arith.addf %87, %144 : vector<8x32xf32>
    %146 = vector.shape_cast %145 : vector<8x32xf32> to vector<1x8x32xf32>
    %c0_47 = arith.constant 0 : index
    %c0_48 = arith.constant 0 : index
    %c0_49 = arith.constant 0 : index
    %147 = vector.load %arg14[%c0_47, %c0_48, %c0_49] : memref<1x8x32xf32, #tpu.memory_space<vmem>>, vector<1x8x32xf32>
    tpu.vector_store %arg14[%c0_47, %c0_48, %c0_49], %146 {strides = array<i32>} : memref<1x8x32xf32, #tpu.memory_space<vmem>>, vector<1x8x32xf32>,
    return
  }
  func.func @transform_0(%arg0: i32) -> (i32, i32, i32) {
    %c0_i32 = arith.constant 0 : i32
    %c0_i32_0 = arith.constant 0 : i32
    %c0_i32_1 = arith.constant 0 : i32
    return %arg0, %c0_i32, %c0_i32_0 : i32, i32, i32
  }
  func.func @transform_1(%arg0: i32) -> (i32, i32) {
    %c0_i32 = arith.constant 0 : i32
    %c0_i32_0 = arith.constant 0 : i32
    %c0_i32_1 = arith.constant 0 : i32
    return %c0_i32, %c0_i32_0 : i32, i32
  }
  func.func @transform_2(%arg0: i32) -> (i32, i32) {
    %c0_i32 = arith.constant 0 : i32
    %c0_i32_0 = arith.constant 0 : i32
    %c0_i32_1 = arith.constant 0 : i32
    return %c0_i32, %c0_i32_0 : i32, i32
  }
  func.func @transform_3(%arg0: i32) -> (i32, i32) {
    %c0_i32 = arith.constant 0 : i32
    %c0_i32_0 = arith.constant 0 : i32
    %c0_i32_1 = arith.constant 0 : i32
    return %c0_i32, %c0_i32_0 : i32, i32
  }
  func.func @transform_4(%arg0: i32) -> (i32, i32) {
    %c0_i32 = arith.constant 0 : i32
    %c0_i32_0 = arith.constant 0 : i32
    %c0_i32_1 = arith.constant 0 : i32
    return %c0_i32, %c0_i32_0 : i32, i32
  }
  func.func @transform_5(%arg0: i32) -> (i32, i32) {
    %c0_i32 = arith.constant 0 : i32
    %c0_i32_0 = arith.constant 0 : i32
    %c0_i32_1 = arith.constant 0 : i32
    return %c0_i32, %c0_i32_0 : i32, i32
  }
  func.func @transform_6(%arg0: i32) -> (i32, i32) {
    %c0_i32 = arith.constant 0 : i32
    %c0_i32_0 = arith.constant 0 : i32
    %c0_i32_1 = arith.constant 0 : i32
    return %c0_i32, %c0_i32_0 : i32, i32
  }
  func.func @transform_7(%arg0: i32) -> (i32, i32) {
    %c0_i32 = arith.constant 0 : i32
    %c0_i32_0 = arith.constant 0 : i32
    %c0_i32_1 = arith.constant 0 : i32
    return %c0_i32, %c0_i32_0 : i32, i32
  }
  func.func @transform_8(%arg0: i32) -> (i32, i32) {
    %c0_i32 = arith.constant 0 : i32
    %c0_i32_0 = arith.constant 0 : i32
    %c0_i32_1 = arith.constant 0 : i32
    return %c0_i32, %c0_i32_0 : i32, i32
  }
  func.func @transform_9(%arg0: i32) -> (i32, i32) {
    %c0_i32 = arith.constant 0 : i32
    %c0_i32_0 = arith.constant 0 : i32
    %c0_i32_1 = arith.constant 0 : i32
    return %c0_i32, %c0_i32_0 : i32, i32
  }
  func.func @transform_10(%arg0: i32) -> (i32, i32) {
    %c0_i32 = arith.constant 0 : i32
    %c0_i32_0 = arith.constant 0 : i32
    %c0_i32_1 = arith.constant 0 : i32
    return %c0_i32, %c0_i32_0 : i32, i32
  }
  func.func @transform_11(%arg0: i32) -> (i32, i32) {
    %c0_i32 = arith.constant 0 : i32
    %c0_i32_0 = arith.constant 0 : i32
    %c0_i32_1 = arith.constant 0 : i32
    return %c0_i32, %c0_i32_0 : i32, i32
  }
  func.func @transform_12(%arg0: i32) -> (i32, i32) {
    %c0_i32 = arith.constant 0 : i32
    %c0_i32_0 = arith.constant 0 : i32
    %c0_i32_1 = arith.constant 0 : i32
    return %c0_i32, %c0_i32_0 : i32, i32
  }
  func.func @transform_13(%arg0: i32) -> (i32, i32, i32) {
    %c0_i32 = arith.constant 0 : i32
    %c0_i32_0 = arith.constant 0 : i32
    %c0_i32_1 = arith.constant 0 : i32
    return %arg0, %c0_i32, %c0_i32_0 : i32, i32, i32
  }
}

</mosaic_0001>

<bundles_post_ra>
// kernel: transformer_forward.2
= control target key start
LH: loop header
LB: loop body
LE: loop exit
PB: predicated region body
PF: predicated region fallthrough
CT: control target
= control target key end

     0   :  { %s1648_s25 = smov 0   ;;  %s1836_s0 = inlined_call_operand.vmem [shape: f32[2,8,32], index: 0, kind: input, shape index: {}, may-alias: {0,13}]   ;;  %s1837_s1 = inlined_call_operand.vmem [shape: f32[1,32], index: 1, kind: input, shape index: {}]   ;;  %s1838_s2 = inlined_call_operand.vmem [shape: f32[1,32], index: 2, kind: input, shape index: {}]   ;;  %s1839_s3 = inlined_call_operand.vmem [shape: bf16[32,96], index: 3, kind: input, shape index: {}]   ;;  %s1840_s4 = inlined_call_operand.vmem [shape: f32[1,96], index: 4, kind: input, shape index: {}]   ;;  %s1841_s5 = inlined_call_operand.vmem [shape: bf16[32,32], index: 5, kind: input, shape index: {}]   ;;  %s1842_s6 = inlined_call_operand.vmem [shape: f32[1,32], index: 6, kind: input, shape index: {}]   ;;  %s1843_s7 = inlined_call_operand.vmem [shape: f32[1,32], index: 7, kind: input, shape index: {}]   ;;  %s1844_s8 = inlined_call_operand.vmem [shape: f32[1,32], index: 8, kind: input, shape index: {}]   ;;  %s1845_s9 = inlined_call_operand.vmem [shape: bf16[32,128], index: 9, kind: input, shape index: {}]   ;;  %s1846_s10 = inlined_call_operand.vmem [shape: f32[1,128], index: 10, kind: input, shape index: {}]   ;;  %s1847_s11 = inlined_call_operand.vmem [shape: bf16[128,32], index: 11, kind: input, shape index: {}]   ;;  %s1848_s12 = inlined_call_operand.vmem [shape: f32[1,32], index: 12, kind: input, shape index: {}]   ;;  %s1849_s13 = inlined_call_operand.vmem [shape: f32[2,8,32], index: 13, kind: output, shape index: {}, may-alias: {0,13}]  }
   0x1 LB: > { %s1338_s26 = sadd.s32 4294967295, %s1566_s25   ;;  %p1342_p0 = scmp.ge.s32.totalorder %s1566_s25, 1  ;;  %s1566_s25 = sphi %s1648_s25, %s23_s25  }
   0x2   : > { %p386_p1 = scmp.lt.s32.totalorder %s1566_s25, 3 }
   0x4   : > { %p387_p2 = pnand %p1342_p0, %p386_p1 }
   0x5   : > { %p428_p3 = scmp.lt.s32.totalorder (!%p387_p2), %s1338_s26, 1  ;;  %s1570_s24 = smov (!%p387_p2), 104  }
   0x6   : > { %390 = sbr.rel (%p387_p2) target bundleno = 2364 (0x93c), region = 72  ;;  %s1571_s28 = smov (!%p387_p2), 120  }
   0x7   : > { %s1572_s29 = smov (!%p387_p2), 112   ;;  %s1574_s14 = smov (!%p387_p2), 64  }
   0x8   : > { %s1575_s19 = smov (!%p387_p2), 8   ;;  %s1576_s20 = smov (!%p387_p2), 16  }
   0x9   : > { %s1577_s21 = smov (!%p387_p2), 24  }
   0xb   : > { %s1851_s26 = smov (!%p428_p3, %s1338_s26), 1  ;;  %vm440_vm0 = vcmask 261120   ;;  %v1524_v7 = vld [vmem:[%s1839_s3 + $0x8] sm:$0xff]   ;;  %v1568_v8 = vmov 0.0   ;;  %vm1569_vm1 = vmmov 0   ;;  %v1525_v9 = vld [vmem:[%s1839_s3] sm:$0xff]  }
   0xc   : > { %s1343_s27 = sshll.u32 %s1851_s26, 3  ;;  %1414 = vmatprep.subr.bf16.mxu0 %v1568_v8  ;;  %1418 = vmatprep.mubr.msk.bf16.mxu0 %vm1569_vm1, %v1568_v8  ;;  %v1345_v14 = vld [vmem:[%s1837_s1] ss:$0 sm:$0xff]  ;;  %vm546_vm2 = vcmask 64512   ;;  %vm782_vm3 = vcmask 1043456   ;;  %vm994_vm4 = vcmask 130048  }
   0xd   : > { %s431_s30 = scalar_lea.vmem %s1836_s0, %s1343_s27  ;;  %1415 = vmatpush3.bf16.msra.mxu0 %v1524_v7  ;;  %1434 = vmatprep.subr.bf16.mxu1 %v1568_v8  ;;  %v1346_v16 = vld [vmem:[%s1838_s2] ss:$0 sm:$0xff]  ;;  %vm997_vm5 = vcmask 195584  }
   0xe   : > { %v1664_v0 = vld [vmem:[%s431_s30] sm:$0xff]  ;;  %1416 = vmatprep.subr.bf16.mxu0 %v1568_v8  ;;  %1436 = vmatprep.mubr.msk.bf16.mxu1 %vm1569_vm1, %v1568_v8  ;;  %s1573_s30 = smov 96  }
   0xf   : > { %v441_v1 = vsel %vm440_vm0, %v1664_v0, 0.0  ;;  %v1347_v20 = vld [vmem:[%s1840_s4] ss:$0 sm:$0xff] }
  0x10   : > { %442 = vadd.xlane.f32.xlu0 %v441_v1 }
  0x11   : > { %1417 = vmatpush3.bf16.msra.mxu0 %v1525_v9 }
  0x12   : > { %1422 = vmatprep.subr.bf16.mxu0 %v1568_v8 }
  0x99   : > { %v443_v2 = vpop.xlane.xlu0 %442 }
  0x9a   : > { %v445_v3 = vmul.f32 0.03125, %v443_v2 }
  0x9c   : > { %v446_v4 = vsub.f32 %v1664_v0, %v445_v3 }
  0x9e   : > { %v447_v5 = vmul.f32 %v446_v4, %v446_v4 }
  0xa0   : > { %v448_v6 = vsel %vm440_vm0, %v447_v5, 0.0 }
  0xa1   : > { %449 = vadd.xlane.f32.xlu0 %v448_v6 }
 0x12a   : > { %v450_v10 = vpop.xlane.xlu0 %449 }
 0x12b   : > { %v451_v11 = vmul.f32 0.03125, %v450_v10 }
 0x12d   : > { %v452_v12 = vadd.f32 1e-05, %v451_v11 }
 0x12f   : > { %1538 = vrsqrt.f32 %v452_v12 }
 0x13c   : > { %v1539_v13 = vpop.eup %1538 }
 0x13d   : > { %v454_v15 = vmul.f32 %v1539_v13, %v446_v4 }
 0x13f   : > { %v461_v17 = vmul.f32 %v1345_v14, %v454_v15 }
 0x141   : > { %v468_v18 = vadd.f32 %v1346_v16, %v461_v17 }
 0x143   : > { %v469_v19 = vpack.c.bf16 %v468_v18, %v468_v18 }
 0x145   : > { %1419 = vmatmul.mubr.msk.bf16.vlgmr.msra.gmra.mxu0 %vm440_vm0, %v469_v19 }
 0x146   : > { %1424 = vmatprep.mubr.msk.bf16.mxu0 %vm1569_vm1, %v1568_v8 }
 0x205   : > { %v530_v21 = vpop.f32.mrf.mxu0 }
 0x206   : > { %v531_v22 = vadd.f32 %v1347_v20, %v530_v21 }
 0x207   : > { %v1420_v23 = vpop.f32.mrf.mxu0 }
 0x208   : > { %v536_v24 = vpack.c.bf16 %v531_v22, %v531_v22 }
 0x209   : > { %v533_v25 = vpop.f32.mrf.mxu0 }
 0x20a   : > { %542 = vrot.lane.b32.xlu0 %v536_v24, %s1570_s24  ;;  %538 = vrot.lane.b32.xlu1 %v536_v24, %s1571_s28 }
 0x20b   : > { %v1421_v26 = vpop.f32.mrf.mxu0 }
 0x20e   : > { %540 = vrot.lane.b32.xlu1 %v536_v24, %s1572_s29  ;;  %s435_s29 = scalar_lea.vmem %s1849_s13, %s1343_s27 }
 0x212   : > { %544 = vrot.lane.b32.xlu1 %v536_v24, %s1573_s30 }
 0x27c   : > { %v1696_v27 = vpop.permute.xlu1 %538  ;;  %v543_v29 = vpop.permute.xlu0 %542 }
 0x27d   : > { %593 = vrot.lane.b32.xlu1 %v1696_v27, %s1573_s30 }
 0x280   : > { %v541_v28 = vpop.permute.xlu1 %540 }
 0x281   : > { %641 = vrot.lane.b32.xlu1 %v541_v28, %s1573_s30 }
 0x284   : > { %v545_v30 = vpop.permute.xlu1 %544 }
 0x285   : > { %v551_v31 = vsel %vm546_vm2, %v545_v30, 0  ;;  %689 = vrot.lane.b32.xlu1 %v543_v29, %s1573_s30 }
 0x286   : > { %1423 = vmatpush3.bf16.xpose.msra.mxu0 %v551_v31 }
 0x287   : > { %1428 = vmatprep.subr.bf16.mxu0 %v1568_v8 }
 0x289   : > { %777 = vrot.lane.b32.xlu1 %v536_v24, %s1574_s14 }
 0x28d   : > { %1425 = vmatmul.mubr.msk.bf16.vlgmr.msra.gmra.mxu0 %vm546_vm2, %v536_v24 }
 0x28e   : > { %1430 = vmatprep.mubr.msk.bf16.mxu0 %vm1569_vm1, %v1568_v8 }
 0x2ef   : > { %v594_v32 = vpop.permute.xlu1 %593 }
 0x2f0   : > { %v599_v33 = vsel %vm546_vm2, %v594_v32, 0 }
 0x2f1   : > { %1429 = vmatpush3.bf16.xpose.msra.mxu0 %v599_v33 }
 0x2f2   : > { %1440 = vmatprep.subr.bf16.mxu0 %v1568_v8 }
 0x2f3   : > { %v642_v34 = vpop.permute.xlu1 %641 }
 0x2f4   : > { %v647_v35 = vsel %vm546_vm2, %v642_v34, 0 }
 0x2f5   : > { %1435 = vmatpush3.bf16.xpose.msra.mxu1 %v647_v35  ;;  %v1526_v35 = vld [vmem:[%s1841_s5 + $0x8] sm:$0xff]  }
 0x2f6   : > { %1446 = vmatprep.subr.bf16.mxu1 %v1568_v8 }
 0x2f7   : > { %v690_v36 = vpop.permute.xlu1 %689 }
 0x2f8   : > { %v695_v37 = vsel %vm546_vm2, %v690_v36, 0  ;;  %1431 = vmatmul.mubr.msk.bf16.vlgmr.msra.gmra.mxu0 %vm546_vm2, %v1696_v27  ;;  %v1527_v36 = vld [vmem:[%s1841_s5] sm:$0xff]  }
 0x2f9   : > { %1441 = vmatpush3.bf16.xpose.msra.mxu0 %v695_v37  ;;  %1442 = vmatprep.mubr.msk.bf16.mxu0 %vm1569_vm1, %v1568_v8 }
 0x2fa   : > { %1452 = vmatprep.subr.bf16.mxu0 %v1568_v8 }
 0x2fb   : > { %v778_v38 = vpop.permute.xlu1 %777 }
 0x2fc   : > { %v784_v39 = vsel %vm782_vm3, %v778_v38, 0  ;;  %1437 = vmatmul.mubr.msk.bf16.vlgmr.msra.gmra.mxu1 %vm546_vm2, %v541_v28 }
 0x2fd   : > { %1447 = vmatpush3.bf16.msra.mxu1 %v784_v39  ;;  %1448 = vmatprep.mubr.msk.bf16.mxu1 %vm1569_vm1, %v1568_v8 }
 0x2fe   : > { %1458 = vmatprep.subr.bf16.mxu1 %v1568_v8 }
 0x300   : > { %1443 = vmatmul.mubr.msk.bf16.vlgmr.msra.gmra.mxu0 %vm546_vm2, %v543_v29 }
 0x301   : > { %1454 = vmatprep.mubr.msk.bf16.mxu0 %vm1569_vm1, %v1568_v8 }
 0x34d   : > { %v587_v40 = vpop.f32.mrf.mxu0 }
 0x34e   : > { %v737_v41 = vsel %vm546_vm2, %v587_v40, -inf }
 0x34f   : > { %738 = vmax.xlane.f32.xlu1 %v737_v41  ;;  %v1426_v42 = vpop.f32.mrf.mxu0 }
 0x351   : > { %v590_v43 = vpop.f32.mrf.mxu0 }
 0x353   : > { %v1427_v44 = vpop.f32.mrf.mxu0 }
 0x3b8   : > { %v635_v45 = vpop.f32.mrf.mxu0 }
 0x3b9   : > { %v740_v46 = vsel %vm546_vm2, %v635_v45, -inf }
 0x3ba   : > { %741 = vmax.xlane.f32.xlu0 %v740_v46  ;;  %v1432_v47 = vpop.f32.mrf.mxu0 }
 0x3bc   : > { %v638_v48 = vpop.f32.mrf.mxu0  ;;  %v683_v49 = vpop.f32.mrf.mxu1 }
 0x3bd   : > { %v743_v50 = vsel %vm546_vm2, %v683_v49, -inf }
 0x3be   : > { %v1438_v51 = vpop.f32.mrf.mxu1  ;;  %744 = vmax.xlane.f32.xlu1 %v743_v50  ;;  %v1433_v52 = vpop.f32.mrf.mxu0 }
 0x3c0   : > { %v686_v53 = vpop.f32.mrf.mxu1  ;;  %v731_v54 = vpop.f32.mrf.mxu0 }
 0x3c1   : > { %v746_v55 = vsel %vm546_vm2, %v731_v54, -inf }
 0x3c2   : > { %v1439_v56 = vpop.f32.mrf.mxu1  ;;  %747 = vmax.xlane.f32.xlu0 %v746_v55  ;;  %v1444_v57 = vpop.f32.mrf.mxu0 }
 0x3c4   : > { %v734_v58 = vpop.f32.mrf.mxu0 }
 0x3c6   : > { %v1445_v59 = vpop.f32.mrf.mxu0 }
 0x3cf   : > { %874 = vrot.lane.b32.xlu1 %v541_v28, %s1574_s14 }
 0x3d3   : > { %922 = vrot.lane.b32.xlu1 %v543_v29, %s1574_s14 }
 0x3d8   : > { %v739_v60 = vpop.xlane.xlu1 %738  ;;  %826 = vrot.lane.b32.xlu0 %v1696_v27, %s1574_s14 }
 0x3d9   : > { %v749_v61 = vsub.f32 %v587_v40, %v739_v60 }
 0x3db   : > { %v753_v62 = vmul.f32 1.442695, %v749_v61 }
 0x3dd   : > { %1540 = vpow2.f32 %v753_v62 }
 0x3ea   : > { %v1541_v63 = vpop.eup %1540 }
 0x3eb   : > { %v773_v1 = vpack.c.bf16 %v1541_v63, %v1541_v63  ;;  %v761_v27 = vsel %vm546_vm2, %v1541_v63, 0.0 }
 0x3ed   : > { %1449 = vmatmul.mubr.msk.bf16.vlgmr.msra.gmra.mxu1 %vm546_vm2, %v773_v1 }
 0x3ee   : > { %1460 = vmatprep.mubr.msk.bf16.mxu1 %vm1569_vm1, %v1568_v8 }
 0x443   : > { %v742_v2 = vpop.xlane.xlu0 %741 }
 0x444   : > { %v750_v3 = vsub.f32 %v635_v45, %v742_v2 }
 0x446   : > { %v755_v4 = vmul.f32 1.442695, %v750_v3 }
 0x447   : > { %v745_v5 = vpop.xlane.xlu1 %744 }
 0x448   : > { %1542 = vpow2.f32 %v755_v4  ;;  %v751_v6 = vsub.f32 %v683_v49, %v745_v5  ;;  %v1359_v5 = vld [vmem:[%s1842_s6] ss:$0 sm:$0xff] }
 0x44a   : > { %v757_v7 = vmul.f32 1.442695, %v751_v6 }
 0x44b   : > { %v875_v9 = vpop.permute.xlu1 %874  ;;  %v748_v10 = vpop.xlane.xlu0 %747 }
 0x44c   : > { %1544 = vpow2.f32 %v757_v7  ;;  %v880_v11 = vsel %vm782_vm3, %v875_v9, 0  ;;  %v752_v12 = vsub.f32 %v731_v54, %v748_v10 }
 0x44d   : > { %1459 = vmatpush3.bf16.msra.mxu1 %v880_v11 }
 0x44e   : > { %v759_v13 = vmul.f32 1.442695, %v752_v12  ;;  %1470 = vmatprep.subr.bf16.mxu1 %v1568_v8 }
 0x44f   : > { %v827_v14 = vpop.permute.xlu0 %826  ;;  %v923_v17 = vpop.permute.xlu1 %922 }
 0x450   : > { %1546 = vpow2.f32 %v759_v13  ;;  %v832_v15 = vsel %vm782_vm3, %v827_v14, 0  ;;  %v928_v20 = vsel %vm782_vm3, %v923_v17, 0 }
 0x451   : > { %1453 = vmatpush3.bf16.msra.mxu0 %v832_v15 }
 0x452   : > { %1464 = vmatprep.subr.bf16.mxu0 %v1568_v8 }
 0x455   : > { %v1543_v16 = vpop.eup %1542 }
 0x456   : > { %v764_v18 = vsel %vm546_vm2, %v1543_v16, 0.0  ;;  %v774_v19 = vpack.c.bf16 %v1543_v16, %v1543_v16 }
 0x457   : > { %765 = vadd.xlane.f32.xlu0 %v764_v18 }
 0x458   : > { %1455 = vmatmul.mubr.msk.bf16.vlgmr.msra.gmra.mxu0 %vm546_vm2, %v774_v19  ;;  %v1528_v19 = vld [vmem:[%s1845_s9 + $0x8] sm:$0xff]  }
 0x459   : > { %v1545_v21 = vpop.eup %1544  ;;  %1465 = vmatpush3.bf16.msra.mxu0 %v928_v20  ;;  %1466 = vmatprep.mubr.msk.bf16.mxu0 %vm1569_vm1, %v1568_v8 }
 0x45a   : > { %v767_v22 = vsel %vm546_vm2, %v1545_v21, 0.0  ;;  %v775_v23 = vpack.c.bf16 %v1545_v21, %v1545_v21  ;;  %1478 = vmatprep.subr.bf16.mxu0 %v1568_v8 }
 0x45b   : > { %768 = vadd.xlane.f32.xlu1 %v767_v22 }
 0x45c   : > { %1461 = vmatmul.mubr.msk.bf16.vlgmr.msra.gmra.mxu1 %vm546_vm2, %v775_v23 }
 0x45d   : > { %v1547_v24 = vpop.eup %1546  ;;  %1474 = vmatprep.mubr.msk.bf16.mxu1 %vm1569_vm1, %v1568_v8  ;;  %1471 = vmatpush3.bf16.msra.mxu1 %v1526_v35  ;;  %v1535_v35 = vld [vmem:[%s1847_s11 + $0x10] sm:$0xff]  }
 0x45e   : > { %v770_v25 = vsel %vm546_vm2, %v1547_v24, 0.0  ;;  %v776_v26 = vpack.c.bf16 %v1547_v24, %v1547_v24  ;;  %1472 = vmatprep.subr.bf16.mxu1 %v1568_v8  ;;  %v1363_v24 = vld [vmem:[%s1843_s7] ss:$0 sm:$0xff] }
 0x45f   : > { %771 = vadd.xlane.f32.xlu0 %v770_v25 }
 0x460   : > { %1467 = vmatmul.mubr.msk.bf16.vlgmr.msra.gmra.mxu0 %vm546_vm2, %v776_v26  ;;  %v1364_v26 = vld [vmem:[%s1844_s8] ss:$0 sm:$0xff] }
 0x461   : > { %1482 = vmatprep.mubr.msk.bf16.mxu0 %vm1569_vm1, %v1568_v8  ;;  %1473 = vmatpush3.bf16.msra.mxu1 %v1527_v36  ;;  %v1536_v36 = vld [vmem:[%s1847_s11 + $0x8] sm:$0xff]  }
 0x462   : > { %1486 = vmatprep.subr.bf16.mxu1 %v1568_v8  ;;  %1479 = vmatpush3.bf16.msra.mxu0 %v1528_v19 }
 0x463   : > { %762 = vadd.xlane.f32.xlu0 %v761_v27  ;;  %1480 = vmatprep.subr.bf16.mxu0 %v1568_v8 }
 0x4ad   : > { %v820_v28 = vpop.f32.mrf.mxu1 }
 0x4af   : > { %v1450_v29 = vpop.f32.mrf.mxu1 }
 0x4b1   : > { %v823_v30 = vpop.f32.mrf.mxu1 }
 0x4b2   : > { %v1530_v30 = vld [vmem:[%s1847_s11 + $0x38] sm:$0xff]  }
 0x4b3   : > { %v1451_v31 = vpop.f32.mrf.mxu1 }
 0x4b4   : > { %v1531_v31 = vld [vmem:[%s1847_s11 + $0x30] sm:$0xff]  }
 0x4e0   : > { %v766_v32 = vpop.xlane.xlu0 %765 }
 0x4e1   : > { %1548 = vrcp.f32 %v766_v32  ;;  %v1532_v32 = vld [vmem:[%s1847_s11 + $0x28] sm:$0xff]  }
 0x4e4   : > { %v769_v33 = vpop.xlane.xlu1 %768 }
 0x4e5   : > { %1550 = vrcp.f32 %v769_v33  ;;  %v1533_v33 = vld [vmem:[%s1847_s11 + $0x20] sm:$0xff]  }
 0x4e8   : > { %v772_v34 = vpop.xlane.xlu0 %771 }
 0x4e9   : > { %1552 = vrcp.f32 %v772_v34  ;;  %v1534_v34 = vld [vmem:[%s1847_s11 + $0x18] sm:$0xff]  }
 0x4ec   : > { %v763_v58 = vpop.xlane.xlu0 %762 }
 0x4ed   : > { %1554 = vrcp.f32 %v763_v58 }
 0x4ee   : > { %v1549_v37 = vpop.eup %1548 }
 0x4f2   : > { %v1551_v42 = vpop.eup %1550 }
 0x4f6   : > { %v1553_v49 = vpop.eup %1552 }
 0x4fa   : > { %v1555_v59 = vpop.eup %1554 }
 0x4fb   : > { %v974_v60 = vmul.f32 %v1555_v59, %v820_v28 }
 0x4fd   : > { %v978_v62 = vpack.c.bf16 %v974_v60, %v974_v60 }
 0x518   : > { %v868_v38 = vpop.f32.mrf.mxu0 }
 0x519   : > { %v975_v39 = vmul.f32 %v1549_v37, %v868_v38  ;;  %v1537_v37 = vld [vmem:[%s1847_s11] sm:$0xff]  }
 0x51a   : > { %v1456_v40 = vpop.f32.mrf.mxu0  ;;  %v1365_v38 = vld [vmem:[%s1846_s10] ss:$0 sm:$0xff] }
 0x51b   : > { %v979_v41 = vpack.c.bf16 %v975_v39, %v975_v39 }
 0x51c   : > { %v871_v43 = vpop.f32.mrf.mxu0  ;;  %v916_v44 = vpop.f32.mrf.mxu1 }
 0x51d   : > { %v976_v45 = vmul.f32 %v1551_v42, %v916_v44  ;;  %983 = vrot.lane.b32.xlu1 %v979_v41, %s1575_s19 }
 0x51e   : > { %v1457_v46 = vpop.f32.mrf.mxu0  ;;  %v1462_v47 = vpop.f32.mrf.mxu1 }
 0x51f   : > { %v980_v48 = vpack.c.bf16 %v976_v45, %v976_v45 }
 0x520   : > { %v919_v50 = vpop.f32.mrf.mxu1  ;;  %v964_v51 = vpop.f32.mrf.mxu0 }
 0x521   : > { %v977_v52 = vmul.f32 %v1553_v49, %v964_v51  ;;  %986 = vrot.lane.b32.xlu0 %v980_v48, %s1576_s20 }
 0x522   : > { %v1463_v53 = vpop.f32.mrf.mxu1  ;;  %v1468_v54 = vpop.f32.mrf.mxu0 }
 0x523   : > { %v981_v55 = vpack.c.bf16 %v977_v52, %v977_v52  ;;  %v1369_v53 = vld [vmem:[%s1848_s12] ss:$0 sm:$0xff] }
 0x524   : > { %v967_v56 = vpop.f32.mrf.mxu0 }
 0x525   : > { %989 = vrot.lane.b32.xlu1 %v981_v55, %s1577_s21 }
 0x526   : > { %v1469_v57 = vpop.f32.mrf.mxu0 }
 0x58f   : > { %v984_v61 = vpop.permute.xlu1 %983 }
 0x590   : > { %v993_v1 = vsel %vm546_vm2, %v978_v62, %v984_v61 }
 0x593   : > { %v987_v63 = vpop.permute.xlu0 %986 }
 0x594   : > { %v996_v2 = vsel %vm994_vm4, %v993_v1, %v987_v63 }
 0x597   : > { %v990_v3 = vpop.permute.xlu1 %989 }
 0x598   : > { %v999_v4 = vsel %vm997_vm5, %v996_v2, %v990_v3 }
 0x599   : > { %1475 = vmatmul.mubr.msk.bf16.vlgmr.msra.gmra.mxu1 %vm440_vm0, %v999_v4 }
 0x59a   : > { %1502 = vmatprep.mubr.msk.bf16.mxu1 %vm1569_vm1, %v1568_v8  ;;  %1487 = vmatpush3.bf16.msra.mxu1 %v1530_v30 }
 0x59b   : > { %1488 = vmatprep.subr.bf16.mxu1 %v1568_v8 }
 0x59e   : > { %1489 = vmatpush3.bf16.msra.mxu1 %v1531_v31 }
 0x59f   : > { %1490 = vmatprep.subr.bf16.mxu1 %v1568_v8 }
 0x5a2   : > { %1491 = vmatpush3.bf16.msra.mxu1 %v1532_v32 }
 0x5a3   : > { %1492 = vmatprep.subr.bf16.mxu1 %v1568_v8 }
 0x5a6   : > { %1493 = vmatpush3.bf16.msra.mxu1 %v1533_v33 }
 0x5a7   : > { %1494 = vmatprep.subr.bf16.mxu1 %v1568_v8 }
 0x5aa   : > { %1495 = vmatpush3.bf16.msra.mxu1 %v1534_v34 }
 0x5ab   : > { %1496 = vmatprep.subr.bf16.mxu1 %v1568_v8 }
 0x5ae   : > { %1497 = vmatpush3.bf16.msra.mxu1 %v1535_v35 }
 0x5af   : > { %1498 = vmatprep.subr.bf16.mxu1 %v1568_v8 }
 0x5b2   : > { %1499 = vmatpush3.bf16.msra.mxu1 %v1536_v36 }
 0x5b3   : > { %1500 = vmatprep.subr.bf16.mxu1 %v1568_v8 }
 0x5b6   : > { %1501 = vmatpush3.bf16.msra.mxu1 %v1537_v37 }
 0x659   : > { %v1059_v6 = vpop.f32.mrf.mxu1 }
 0x65a   : > { %v1060_v7 = vadd.f32 %v1359_v5, %v1059_v6 }
 0x65b   : > { %v1476_v9 = vpop.f32.mrf.mxu1 }
 0x65c   : > { %v1769_v10 = vadd.f32 %v1060_v7, %v1664_v0  ;;  %v1529_v0 = vld [vmem:[%s1845_s9] sm:$0xff]  }
 0x65d   : > { %v1062_v11 = vpop.f32.mrf.mxu1  ;;  %1481 = vmatpush3.bf16.msra.mxu0 %v1529_v0 }
 0x65e   : > { %v1068_v12 = vsel %vm440_vm0, %v1769_v10, 0.0 }
 0x65f   : > { %1069 = vadd.xlane.f32.xlu1 %v1068_v12  ;;  %v1477_v13 = vpop.f32.mrf.mxu1 }
 0x6e8   : > { %v1070_v14 = vpop.xlane.xlu1 %1069 }
 0x6e9   : > { %v1071_v15 = vmul.f32 0.03125, %v1070_v14 }
 0x6eb   : > { %v1072_v16 = vsub.f32 %v1769_v10, %v1071_v15 }
 0x6ed   : > { %v1073_v17 = vmul.f32 %v1072_v16, %v1072_v16 }
 0x6ef   : > { %v1074_v18 = vsel %vm440_vm0, %v1073_v17, 0.0 }
 0x6f0   : > { %1075 = vadd.xlane.f32.xlu0 %v1074_v18 }
 0x779   : > { %v1076_v20 = vpop.xlane.xlu0 %1075 }
 0x77a   : > { %v1077_v21 = vmul.f32 0.03125, %v1076_v20 }
 0x77c   : > { %v1078_v22 = vadd.f32 1e-05, %v1077_v21 }
 0x77e   : > { %1556 = vrsqrt.f32 %v1078_v22 }
 0x78b   : > { %v1557_v23 = vpop.eup %1556 }
 0x78c   : > { %v1080_v25 = vmul.f32 %v1557_v23, %v1072_v16 }
 0x78e   : > { %v1087_v27 = vmul.f32 %v1363_v24, %v1080_v25 }
 0x790   : > { %v1094_v28 = vadd.f32 %v1364_v26, %v1087_v27 }
 0x792   : > { %v1095_v29 = vpack.c.bf16 %v1094_v28, %v1094_v28 }
 0x794   : > { %1483 = vmatmul.mubr.msk.bf16.vlgmr.msra.gmra.mxu0 %vm440_vm0, %v1095_v29 }
 0x854   : > { %v1156_v39 = vpop.f32.mrf.mxu0 }
 0x855   : > { %v1157_v40 = vadd.f32 %v1365_v38, %v1156_v39 }
 0x856   : > { %v1484_v41 = vpop.f32.mrf.mxu0 }
 0x857   : > { %v1163_v42 = vmul.f32 0.044715, %v1157_v40  ;;  %v1162_v50 = vmul.f32 0.5, %v1157_v40 }
 0x858   : > { %v1159_v43 = vpop.f32.mrf.mxu0 }
 0x859   : > { %v1164_v44 = vmul.f32 %v1163_v42, %v1157_v40 }
 0x85a   : > { %v1485_v45 = vpop.f32.mrf.mxu0 }
 0x85b   : > { %v1165_v46 = vmul.f32 %v1164_v44, %v1157_v40 }
 0x85d   : > { %v1166_v47 = vadd.f32 %v1165_v46, %v1157_v40 }
 0x85f   : > { %v1167_v48 = vmul.f32 0.7978846, %v1166_v47 }
 0x861   : > { %1558 = vtanh.f32 %v1167_v48 }
 0x86e   : > { %v1559_v49 = vpop.eup %1558 }
 0x86f   : > { %v1169_v8 = vadd.f32 1.0, %v1559_v49 }
 0x871   : > { %v1170_v51 = vmul.f32 %v1169_v8, %v1162_v50 }
 0x873   : > { %v1171_v52 = vpack.c.bf16 %v1170_v51, %v1170_v51 }
 0x875   : > { %1503 = vmatmul.mubr.bf16.vlgmr.msra.gmra.mxu1 %v1171_v52 }
 0x935   : > { %v1277_v54 = vpop.f32.mrf.mxu1 }
 0x936   : > { %v1278_v55 = vadd.f32 %v1369_v53, %v1277_v54 }
 0x937   : > { %v1504_v56 = vpop.f32.mrf.mxu1 }
 0x938   : > { %v1283_v57 = vadd.f32 %v1278_v55, %v1769_v10 }
 0x939   : > { %v1280_v58 = vpop.f32.mrf.mxu1 }
 0x93a   : > { %1284 = vst.msk [vmem:[%s435_s29] sm:$0xff] %vm440_vm0, %v1283_v57 }
 0x93b   : > { %v1505_v59 = vpop.f32.mrf.mxu1 }
 0x93c PF: > { %s23_s25 = sadd.s32 1, %s1566_s25  }
 0x93d   : > { %p20_p4 = scmp.ge.s32.totalorder %s23_s25, 4  }
 0x93f   :  { %22 = sbr.rel (!%p20_p4) target bundleno = 1 (0x1), region = 102 }

// kernel: transformer_forward.2
= control target key start
LH: loop header
LB: loop body
LE: loop exit
PB: predicated region body
PF: predicated region fallthrough
CT: control target
= control target key end

     0   :  { %s1648_s25 = smov 0   ;;  %s1836_s0 = inlined_call_operand.vmem [shape: f32[2,8,32], index: 0, kind: input, shape index: {}]   ;;  %s1837_s1 = inlined_call_operand.vmem [shape: f32[1,32], index: 1, kind: input, shape index: {}]   ;;  %s1838_s2 = inlined_call_operand.vmem [shape: f32[1,32], index: 2, kind: input, shape index: {}]   ;;  %s1839_s3 = inlined_call_operand.vmem [shape: bf16[32,96], index: 3, kind: input, shape index: {}]   ;;  %s1840_s4 = inlined_call_operand.vmem [shape: f32[1,96], index: 4, kind: input, shape index: {}]   ;;  %s1841_s5 = inlined_call_operand.vmem [shape: bf16[32,32], index: 5, kind: input, shape index: {}]   ;;  %s1842_s6 = inlined_call_operand.vmem [shape: f32[1,32], index: 6, kind: input, shape index: {}]   ;;  %s1843_s7 = inlined_call_operand.vmem [shape: f32[1,32], index: 7, kind: input, shape index: {}]   ;;  %s1844_s8 = inlined_call_operand.vmem [shape: f32[1,32], index: 8, kind: input, shape index: {}]   ;;  %s1845_s9 = inlined_call_operand.vmem [shape: bf16[32,128], index: 9, kind: input, shape index: {}]   ;;  %s1846_s10 = inlined_call_operand.vmem [shape: f32[1,128], index: 10, kind: input, shape index: {}]   ;;  %s1847_s11 = inlined_call_operand.vmem [shape: bf16[128,32], index: 11, kind: input, shape index: {}]   ;;  %s1848_s12 = inlined_call_operand.vmem [shape: f32[1,32], index: 12, kind: input, shape index: {}]   ;;  %s1849_s13 = inlined_call_operand.vmem [shape: f32[2,8,32], index: 13, kind: output, shape index: {}]  }
   0x1 LB: > { %s1338_s26 = sadd.s32 4294967295, %s1566_s25   ;;  %p1342_p0 = scmp.ge.s32.totalorder %s1566_s25, 1  ;;  %s1566_s25 = sphi %s1648_s25, %s23_s25  }
   0x2   : > { %p386_p1 = scmp.lt.s32.totalorder %s1566_s25, 3 }
   0x4   : > { %p387_p2 = pnand %p1342_p0, %p386_p1 }
   0x5   : > { %p428_p3 = scmp.lt.s32.totalorder (!%p387_p2), %s1338_s26, 1  ;;  %s1570_s24 = smov (!%p387_p2), 104  }
   0x6   : > { %390 = sbr.rel (%p387_p2) target bundleno = 2364 (0x93c), region = 72  ;;  %s1571_s28 = smov (!%p387_p2), 120  }
   0x7   : > { %s1572_s29 = smov (!%p387_p2), 112   ;;  %s1574_s14 = smov (!%p387_p2), 64  }
   0x8   : > { %s1575_s19 = smov (!%p387_p2), 8   ;;  %s1576_s20 = smov (!%p387_p2), 16  }
   0x9   : > { %s1577_s21 = smov (!%p387_p2), 24  }
   0xb   : > { %s1851_s26 = smov (!%p428_p3, %s1338_s26), 1  ;;  %vm440_vm0 = vcmask 261120   ;;  %v1524_v7 = vld [vmem:[%s1839_s3 + $0x8] sm:$0xff]   ;;  %v1568_v8 = vmov 0.0   ;;  %vm1569_vm1 = vmmov 0   ;;  %v1525_v9 = vld [vmem:[%s1839_s3] sm:$0xff]  }
   0xc   : > { %s1343_s27 = sshll.u32 %s1851_s26, 3  ;;  %1414 = vmatprep.subr.bf16.mxu0 %v1568_v8  ;;  %1418 = vmatprep.mubr.msk.bf16.mxu0 %vm1569_vm1, %v1568_v8  ;;  %v1345_v14 = vld [vmem:[%s1837_s1] ss:$0 sm:$0xff]  ;;  %vm546_vm2 = vcmask 64512   ;;  %vm782_vm3 = vcmask 1043456   ;;  %vm994_vm4 = vcmask 130048  }
   0xd   : > { %s431_s30 = scalar_lea.vmem %s1836_s0, %s1343_s27  ;;  %1415 = vmatpush3.bf16.msra.mxu0 %v1524_v7  ;;  %1434 = vmatprep.subr.bf16.mxu1 %v1568_v8  ;;  %v1346_v16 = vld [vmem:[%s1838_s2] ss:$0 sm:$0xff]  ;;  %vm997_vm5 = vcmask 195584  }
   0xe   : > { %v1664_v0 = vld [vmem:[%s431_s30] sm:$0xff]  ;;  %1416 = vmatprep.subr.bf16.mxu0 %v1568_v8  ;;  %1436 = vmatprep.mubr.msk.bf16.mxu1 %vm1569_vm1, %v1568_v8  ;;  %s1573_s30 = smov 96  }
   0xf   : > { %v441_v1 = vsel %vm440_vm0, %v1664_v0, 0.0  ;;  %v1347_v20 = vld [vmem:[%s1840_s4] ss:$0 sm:$0xff] }
  0x10   : > { %442 = vadd.xlane.f32.xlu0 %v441_v1 }
  0x11   : > { %1417 = vmatpush3.bf16.msra.mxu0 %v1525_v9 }
  0x12   : > { %1422 = vmatprep.subr.bf16.mxu0 %v1568_v8 }
  0x99   : > { %v443_v2 = vpop.xlane.xlu0 %442 }
  0x9a   : > { %v445_v3 = vmul.f32 0.03125, %v443_v2 }
  0x9c   : > { %v446_v4 = vsub.f32 %v1664_v0, %v445_v3 }
  0x9e   : > { %v447_v5 = vmul.f32 %v446_v4, %v446_v4 }
  0xa0   : > { %v448_v6 = vsel %vm440_vm0, %v447_v5, 0.0 }
  0xa1   : > { %449 = vadd.xlane.f32.xlu0 %v448_v6 }
 0x12a   : > { %v450_v10 = vpop.xlane.xlu0 %449 }
 0x12b   : > { %v451_v11 = vmul.f32 0.03125, %v450_v10 }
 0x12d   : > { %v452_v12 = vadd.f32 1e-05, %v451_v11 }
 0x12f   : > { %1538 = vrsqrt.f32 %v452_v12 }
 0x13c   : > { %v1539_v13 = vpop.eup %1538 }
 0x13d   : > { %v454_v15 = vmul.f32 %v1539_v13, %v446_v4 }
 0x13f   : > { %v461_v17 = vmul.f32 %v1345_v14, %v454_v15 }
 0x141   : > { %v468_v18 = vadd.f32 %v1346_v16, %v461_v17 }
 0x143   : > { %v469_v19 = vpack.c.bf16 %v468_v18, %v468_v18 }
 0x145   : > { %1419 = vmatmul.mubr.msk.bf16.vlgmr.msra.gmra.mxu0 %vm440_vm0, %v469_v19 }
 0x146   : > { %1424 = vmatprep.mubr.msk.bf16.mxu0 %vm1569_vm1, %v1568_v8 }
 0x205   : > { %v530_v21 = vpop.f32.mrf.mxu0 }
 0x206   : > { %v531_v22 = vadd.f32 %v1347_v20, %v530_v21 }
 0x207   : > { %v1420_v23 = vpop.f32.mrf.mxu0 }
 0x208   : > { %v536_v24 = vpack.c.bf16 %v531_v22, %v531_v22 }
 0x209   : > { %v533_v25 = vpop.f32.mrf.mxu0 }
 0x20a   : > { %542 = vrot.lane.b32.xlu0 %v536_v24, %s1570_s24  ;;  %538 = vrot.lane.b32.xlu1 %v536_v24, %s1571_s28 }
 0x20b   : > { %v1421_v26 = vpop.f32.mrf.mxu0 }
 0x20e   : > { %540 = vrot.lane.b32.xlu1 %v536_v24, %s1572_s29  ;;  %s435_s29 = scalar_lea.vmem %s1849_s13, %s1343_s27 }
 0x212   : > { %544 = vrot.lane.b32.xlu1 %v536_v24, %s1573_s30 }
 0x27c   : > { %v1696_v27 = vpop.permute.xlu1 %538  ;;  %v543_v29 = vpop.permute.xlu0 %542 }
 0x27d   : > { %593 = vrot.lane.b32.xlu1 %v1696_v27, %s1573_s30 }
 0x280   : > { %v541_v28 = vpop.permute.xlu1 %540 }
 0x281   : > { %641 = vrot.lane.b32.xlu1 %v541_v28, %s1573_s30 }
 0x284   : > { %v545_v30 = vpop.permute.xlu1 %544 }
 0x285   : > { %v551_v31 = vsel %vm546_vm2, %v545_v30, 0  ;;  %689 = vrot.lane.b32.xlu1 %v543_v29, %s1573_s30 }
 0x286   : > { %1423 = vmatpush3.bf16.xpose.msra.mxu0 %v551_v31 }
 0x287   : > { %1428 = vmatprep.subr.bf16.mxu0 %v1568_v8 }
 0x289   : > { %777 = vrot.lane.b32.xlu1 %v536_v24, %s1574_s14 }
 0x28d   : > { %1425 = vmatmul.mubr.msk.bf16.vlgmr.msra.gmra.mxu0 %vm546_vm2, %v536_v24 }
 0x28e   : > { %1430 = vmatprep.mubr.msk.bf16.mxu0 %vm1569_vm1, %v1568_v8 }
 0x2ef   : > { %v594_v32 = vpop.permute.xlu1 %593 }
 0x2f0   : > { %v599_v33 = vsel %vm546_vm2, %v594_v32, 0 }
 0x2f1   : > { %1429 = vmatpush3.bf16.xpose.msra.mxu0 %v599_v33 }
 0x2f2   : > { %1440 = vmatprep.subr.bf16.mxu0 %v1568_v8 }
 0x2f3   : > { %v642_v34 = vpop.permute.xlu1 %641 }
 0x2f4   : > { %v647_v35 = vsel %vm546_vm2, %v642_v34, 0 }
 0x2f5   : > { %1435 = vmatpush3.bf16.xpose.msra.mxu1 %v647_v35  ;;  %v1526_v35 = vld [vmem:[%s1841_s5 + $0x8] sm:$0xff]  }
 0x2f6   : > { %1446 = vmatprep.subr.bf16.mxu1 %v1568_v8 }
 0x2f7   : > { %v690_v36 = vpop.permute.xlu1 %689 }
 0x2f8   : > { %v695_v37 = vsel %vm546_vm2, %v690_v36, 0  ;;  %1431 = vmatmul.mubr.msk.bf16.vlgmr.msra.gmra.mxu0 %vm546_vm2, %v1696_v27  ;;  %v1527_v36 = vld [vmem:[%s1841_s5] sm:$0xff]  }
 0x2f9   : > { %1441 = vmatpush3.bf16.xpose.msra.mxu0 %v695_v37  ;;  %1442 = vmatprep.mubr.msk.bf16.mxu0 %vm1569_vm1, %v1568_v8 }
 0x2fa   : > { %1452 = vmatprep.subr.bf16.mxu0 %v1568_v8 }
 0x2fb   : > { %v778_v38 = vpop.permute.xlu1 %777 }
 0x2fc   : > { %v784_v39 = vsel %vm782_vm3, %v778_v38, 0  ;;  %1437 = vmatmul.mubr.msk.bf16.vlgmr.msra.gmra.mxu1 %vm546_vm2, %v541_v28 }
 0x2fd   : > { %1447 = vmatpush3.bf16.msra.mxu1 %v784_v39  ;;  %1448 = vmatprep.mubr.msk.bf16.mxu1 %vm1569_vm1, %v1568_v8 }
 0x2fe   : > { %1458 = vmatprep.subr.bf16.mxu1 %v1568_v8 }
 0x300   : > { %1443 = vmatmul.mubr.msk.bf16.vlgmr.msra.gmra.mxu0 %vm546_vm2, %v543_v29 }
 0x301   : > { %1454 = vmatprep.mubr.msk.bf16.mxu0 %vm1569_vm1, %v1568_v8 }
 0x34d   : > { %v587_v40 = vpop.f32.mrf.mxu0 }
 0x34e   : > { %v737_v41 = vsel %vm546_vm2, %v587_v40, -inf }
 0x34f   : > { %738 = vmax.xlane.f32.xlu1 %v737_v41  ;;  %v1426_v42 = vpop.f32.mrf.mxu0 }
 0x351   : > { %v590_v43 = vpop.f32.mrf.mxu0 }
 0x353   : > { %v1427_v44 = vpop.f32.mrf.mxu0 }
 0x3b8   : > { %v635_v45 = vpop.f32.mrf.mxu0 }
 0x3b9   : > { %v740_v46 = vsel %vm546_vm2, %v635_v45, -inf }
 0x3ba   : > { %741 = vmax.xlane.f32.xlu0 %v740_v46  ;;  %v1432_v47 = vpop.f32.mrf.mxu0 }
 0x3bc   : > { %v638_v48 = vpop.f32.mrf.mxu0  ;;  %v683_v49 = vpop.f32.mrf.mxu1 }
 0x3bd   : > { %v743_v50 = vsel %vm546_vm2, %v683_v49, -inf }
 0x3be   : > { %v1438_v51 = vpop.f32.mrf.mxu1  ;;  %744 = vmax.xlane.f32.xlu1 %v743_v50  ;;  %v1433_v52 = vpop.f32.mrf.mxu0 }
 0x3c0   : > { %v686_v53 = vpop.f32.mrf.mxu1  ;;  %v731_v54 = vpop.f32.mrf.mxu0 }
 0x3c1   : > { %v746_v55 = vsel %vm546_vm2, %v731_v54, -inf }
 0x3c2   : > { %v1439_v56 = vpop.f32.mrf.mxu1  ;;  %747 = vmax.xlane.f32.xlu0 %v746_v55  ;;  %v1444_v57 = vpop.f32.mrf.mxu0 }
 0x3c4   : > { %v734_v58 = vpop.f32.mrf.mxu0 }
 0x3c6   : > { %v1445_v59 = vpop.f32.mrf.mxu0 }
 0x3cf   : > { %874 = vrot.lane.b32.xlu1 %v541_v28, %s1574_s14 }
 0x3d3   : > { %922 = vrot.lane.b32.xlu1 %v543_v29, %s1574_s14 }
 0x3d8   : > { %v739_v60 = vpop.xlane.xlu1 %738  ;;  %826 = vrot.lane.b32.xlu0 %v1696_v27, %s1574_s14 }
 0x3d9   : > { %v749_v61 = vsub.f32 %v587_v40, %v739_v60 }
 0x3db   : > { %v753_v62 = vmul.f32 1.442695, %v749_v61 }
 0x3dd   : > { %1540 = vpow2.f32 %v753_v62 }
 0x3ea   : > { %v1541_v63 = vpop.eup %1540 }
 0x3eb   : > { %v773_v1 = vpack.c.bf16 %v1541_v63, %v1541_v63  ;;  %v761_v27 = vsel %vm546_vm2, %v1541_v63, 0.0 }
 0x3ed   : > { %1449 = vmatmul.mubr.msk.bf16.vlgmr.msra.gmra.mxu1 %vm546_vm2, %v773_v1 }
 0x3ee   : > { %1460 = vmatprep.mubr.msk.bf16.mxu1 %vm1569_vm1, %v1568_v8 }
 0x443   : > { %v742_v2 = vpop.xlane.xlu0 %741 }
 0x444   : > { %v750_v3 = vsub.f32 %v635_v45, %v742_v2 }
 0x446   : > { %v755_v4 = vmul.f32 1.442695, %v750_v3 }
 0x447   : > { %v745_v5 = vpop.xlane.xlu1 %744 }
 0x448   : > { %1542 = vpow2.f32 %v755_v4  ;;  %v751_v6 = vsub.f32 %v683_v49, %v745_v5  ;;  %v1359_v5 = vld [vmem:[%s1842_s6] ss:$0 sm:$0xff] }
 0x44a   : > { %v757_v7 = vmul.f32 1.442695, %v751_v6 }
 0x44b   : > { %v875_v9 = vpop.permute.xlu1 %874  ;;  %v748_v10 = vpop.xlane.xlu0 %747 }
 0x44c   : > { %1544 = vpow2.f32 %v757_v7  ;;  %v880_v11 = vsel %vm782_vm3, %v875_v9, 0  ;;  %v752_v12 = vsub.f32 %v731_v54, %v748_v10 }
 0x44d   : > { %1459 = vmatpush3.bf16.msra.mxu1 %v880_v11 }
 0x44e   : > { %v759_v13 = vmul.f32 1.442695, %v752_v12  ;;  %1470 = vmatprep.subr.bf16.mxu1 %v1568_v8 }
 0x44f   : > { %v827_v14 = vpop.permute.xlu0 %826  ;;  %v923_v17 = vpop.permute.xlu1 %922 }
 0x450   : > { %1546 = vpow2.f32 %v759_v13  ;;  %v832_v15 = vsel %vm782_vm3, %v827_v14, 0  ;;  %v928_v20 = vsel %vm782_vm3, %v923_v17, 0 }
 0x451   : > { %1453 = vmatpush3.bf16.msra.mxu0 %v832_v15 }
 0x452   : > { %1464 = vmatprep.subr.bf16.mxu0 %v1568_v8 }
 0x455   : > { %v1543_v16 = vpop.eup %1542 }
 0x456   : > { %v764_v18 = vsel %vm546_vm2, %v1543_v16, 0.0  ;;  %v774_v19 = vpack.c.bf16 %v1543_v16, %v1543_v16 }
 0x457   : > { %765 = vadd.xlane.f32.xlu0 %v764_v18 }
 0x458   : > { %1455 = vmatmul.mubr.msk.bf16.vlgmr.msra.gmra.mxu0 %vm546_vm2, %v774_v19  ;;  %v1528_v19 = vld [vmem:[%s1845_s9 + $0x8] sm:$0xff]  }
 0x459   : > { %v1545_v21 = vpop.eup %1544  ;;  %1465 = vmatpush3.bf16.msra.mxu0 %v928_v20  ;;  %1466 = vmatprep.mubr.msk.bf16.mxu0 %vm1569_vm1, %v1568_v8 }
 0x45a   : > { %v767_v22 = vsel %vm546_vm2, %v1545_v21, 0.0  ;;  %v775_v23 = vpack.c.bf16 %v1545_v21, %v1545_v21  ;;  %1478 = vmatprep.subr.bf16.mxu0 %v1568_v8 }
 0x45b   : > { %768 = vadd.xlane.f32.xlu1 %v767_v22 }
 0x45c   : > { %1461 = vmatmul.mubr.msk.bf16.vlgmr.msra.gmra.mxu1 %vm546_vm2, %v775_v23 }
 0x45d   : > { %v1547_v24 = vpop.eup %1546  ;;  %1474 = vmatprep.mubr.msk.bf16.mxu1 %vm1569_vm1, %v1568_v8  ;;  %1471 = vmatpush3.bf16.msra.mxu1 %v1526_v35  ;;  %v1535_v35 = vld [vmem:[%s1847_s11 + $0x10] sm:$0xff]  }
 0x45e   : > { %v770_v25 = vsel %vm546_vm2, %v1547_v24, 0.0  ;;  %v776_v26 = vpack.c.bf16 %v1547_v24, %v1547_v24  ;;  %1472 = vmatprep.subr.bf16.mxu1 %v1568_v8  ;;  %v1363_v24 = vld [vmem:[%s1843_s7] ss:$0 sm:$0xff] }
 0x45f   : > { %771 = vadd.xlane.f32.xlu0 %v770_v25 }
 0x460   : > { %1467 = vmatmul.mubr.msk.bf16.vlgmr.msra.gmra.mxu0 %vm546_vm2, %v776_v26  ;;  %v1364_v26 = vld [vmem:[%s1844_s8] ss:$0 sm:$0xff] }
 0x461   : > { %1482 = vmatprep.mubr.msk.bf16.mxu0 %vm1569_vm1, %v1568_v8  ;;  %1473 = vmatpush3.bf16.msra.mxu1 %v1527_v36  ;;  %v1536_v36 = vld [vmem:[%s1847_s11 + $0x8] sm:$0xff]  }
 0x462   : > { %1486 = vmatprep.subr.bf16.mxu1 %v1568_v8  ;;  %1479 = vmatpush3.bf16.msra.mxu0 %v1528_v19 }
 0x463   : > { %762 = vadd.xlane.f32.xlu0 %v761_v27  ;;  %1480 = vmatprep.subr.bf16.mxu0 %v1568_v8 }
 0x4ad   : > { %v820_v28 = vpop.f32.mrf.mxu1 }
 0x4af   : > { %v1450_v29 = vpop.f32.mrf.mxu1 }
 0x4b1   : > { %v823_v30 = vpop.f32.mrf.mxu1 }
 0x4b2   : > { %v1530_v30 = vld [vmem:[%s1847_s11 + $0x38] sm:$0xff]  }
 0x4b3   : > { %v1451_v31 = vpop.f32.mrf.mxu1 }
 0x4b4   : > { %v1531_v31 = vld [vmem:[%s1847_s11 + $0x30] sm:$0xff]  }
 0x4e0   : > { %v766_v32 = vpop.xlane.xlu0 %765 }
 0x4e1   : > { %1548 = vrcp.f32 %v766_v32  ;;  %v1532_v32 = vld [vmem:[%s1847_s11 + $0x28] sm:$0xff]  }
 0x4e4   : > { %v769_v33 = vpop.xlane.xlu1 %768 }
 0x4e5   : > { %1550 = vrcp.f32 %v769_v33  ;;  %v1533_v33 = vld [vmem:[%s1847_s11 + $0x20] sm:$0xff]  }
 0x4e8   : > { %v772_v34 = vpop.xlane.xlu0 %771 }
 0x4e9   : > { %1552 = vrcp.f32 %v772_v34  ;;  %v1534_v34 = vld [vmem:[%s1847_s11 + $0x18] sm:$0xff]  }
 0x4ec   : > { %v763_v58 = vpop.xlane.xlu0 %762 }
 0x4ed   : > { %1554 = vrcp.f32 %v763_v58 }
 0x4ee   : > { %v1549_v37 = vpop.eup %1548 }
 0x4f2   : > { %v1551_v42 = vpop.eup %1550 }
 0x4f6   : > { %v1553_v49 = vpop.eup %1552 }
 0x4fa   : > { %v1555_v59 = vpop.eup %1554 }
 0x4fb   : > { %v974_v60 = vmul.f32 %v1555_v59, %v820_v28 }
 0x4fd   : > { %v978_v62 = vpack.c.bf16 %v974_v60, %v974_v60 }
 0x518   : > { %v868_v38 = vpop.f32.mrf.mxu0 }
 0x519   : > { %v975_v39 = vmul.f32 %v1549_v37, %v868_v38  ;;  %v1537_v37 = vld [vmem:[%s1847_s11] sm:$0xff]  }
 0x51a   : > { %v1456_v40 = vpop.f32.mrf.mxu0  ;;  %v1365_v38 = vld [vmem:[%s1846_s10] ss:$0 sm:$0xff] }
 0x51b   : > { %v979_v41 = vpack.c.bf16 %v975_v39, %v975_v39 }
 0x51c   : > { %v871_v43 = vpop.f32.mrf.mxu0  ;;  %v916_v44 = vpop.f32.mrf.mxu1 }
 0x51d   : > { %v976_v45 = vmul.f32 %v1551_v42, %v916_v44  ;;  %983 = vrot.lane.b32.xlu1 %v979_v41, %s1575_s19 }
 0x51e   : > { %v1457_v46 = vpop.f32.mrf.mxu0  ;;  %v1462_v47 = vpop.f32.mrf.mxu1 }
 0x51f   : > { %v980_v48 = vpack.c.bf16 %v976_v45, %v976_v45 }
 0x520   : > { %v919_v50 = vpop.f32.mrf.mxu1  ;;  %v964_v51 = vpop.f32.mrf.mxu0 }
 0x521   : > { %v977_v52 = vmul.f32 %v1553_v49, %v964_v51  ;;  %986 = vrot.lane.b32.xlu0 %v980_v48, %s1576_s20 }
 0x522   : > { %v1463_v53 = vpop.f32.mrf.mxu1  ;;  %v1468_v54 = vpop.f32.mrf.mxu0 }
 0x523   : > { %v981_v55 = vpack.c.bf16 %v977_v52, %v977_v52  ;;  %v1369_v53 = vld [vmem:[%s1848_s12] ss:$0 sm:$0xff] }
 0x524   : > { %v967_v56 = vpop.f32.mrf.mxu0 }
 0x525   : > { %989 = vrot.lane.b32.xlu1 %v981_v55, %s1577_s21 }
 0x526   : > { %v1469_v57 = vpop.f32.mrf.mxu0 }
 0x58f   : > { %v984_v61 = vpop.permute.xlu1 %983 }
 0x590   : > { %v993_v1 = vsel %vm546_vm2, %v978_v62, %v984_v61 }
 0x593   : > { %v987_v63 = vpop.permute.xlu0 %986 }
 0x594   : > { %v996_v2 = vsel %vm994_vm4, %v993_v1, %v987_v63 }
 0x597   : > { %v990_v3 = vpop.permute.xlu1 %989 }
 0x598   : > { %v999_v4 = vsel %vm997_vm5, %v996_v2, %v990_v3 }
 0x599   : > { %1475 = vmatmul.mubr.msk.bf16.vlgmr.msra.gmra.mxu1 %vm440_vm0, %v999_v4 }
 0x59a   : > { %1502 = vmatprep.mubr.msk.bf16.mxu1 %vm1569_vm1, %v1568_v8  ;;  %1487 = vmatpush3.bf16.msra.mxu1 %v1530_v30 }
 0x59b   : > { %1488 = vmatprep.subr.bf16.mxu1 %v1568_v8 }
 0x59e   : > { %1489 = vmatpush3.bf16.msra.mxu1 %v1531_v31 }
 0x59f   : > { %1490 = vmatprep.subr.bf16.mxu1 %v1568_v8 }
 0x5a2   : > { %1491 = vmatpush3.bf16.msra.mxu1 %v1532_v32 }
 0x5a3   : > { %1492 = vmatprep.subr.bf16.mxu1 %v1568_v8 }
 0x5a6   : > { %1493 = vmatpush3.bf16.msra.mxu1 %v1533_v33 }
 0x5a7   : > { %1494 = vmatprep.subr.bf16.mxu1 %v1568_v8 }
 0x5aa   : > { %1495 = vmatpush3.bf16.msra.mxu1 %v1534_v34 }
 0x5ab   : > { %1496 = vmatprep.subr.bf16.mxu1 %v1568_v8 }
 0x5ae   : > { %1497 = vmatpush3.bf16.msra.mxu1 %v1535_v35 }
 0x5af   : > { %1498 = vmatprep.subr.bf16.mxu1 %v1568_v8 }
 0x5b2   : > { %1499 = vmatpush3.bf16.msra.mxu1 %v1536_v36 }
 0x5b3   : > { %1500 = vmatprep.subr.bf16.mxu1 %v1568_v8 }
 0x5b6   : > { %1501 = vmatpush3.bf16.msra.mxu1 %v1537_v37 }
 0x659   : > { %v1059_v6 = vpop.f32.mrf.mxu1 }
 0x65a   : > { %v1060_v7 = vadd.f32 %v1359_v5, %v1059_v6 }
 0x65b   : > { %v1476_v9 = vpop.f32.mrf.mxu1 }
 0x65c   : > { %v1769_v10 = vadd.f32 %v1060_v7, %v1664_v0  ;;  %v1529_v0 = vld [vmem:[%s1845_s9] sm:$0xff]  }
 0x65d   : > { %v1062_v11 = vpop.f32.mrf.mxu1  ;;  %1481 = vmatpush3.bf16.msra.mxu0 %v1529_v0 }
 0x65e   : > { %v1068_v12 = vsel %vm440_vm0, %v1769_v10, 0.0 }
 0x65f   : > { %1069 = vadd.xlane.f32.xlu1 %v1068_v12  ;;  %v1477_v13 = vpop.f32.mrf.mxu1 }
 0x6e8   : > { %v1070_v14 = vpop.xlane.xlu1 %1069 }
 0x6e9   : > { %v1071_v15 = vmul.f32 0.03125, %v1070_v14 }
 0x6eb   : > { %v1072_v16 = vsub.f32 %v1769_v10, %v1071_v15 }
 0x6ed   : > { %v1073_v17 = vmul.f32 %v1072_v16, %v1072_v16 }
 0x6ef   : > { %v1074_v18 = vsel %vm440_vm0, %v1073_v17, 0.0 }
 0x6f0   : > { %1075 = vadd.xlane.f32.xlu0 %v1074_v18 }
 0x779   : > { %v1076_v20 = vpop.xlane.xlu0 %1075 }
 0x77a   : > { %v1077_v21 = vmul.f32 0.03125, %v1076_v20 }
 0x77c   : > { %v1078_v22 = vadd.f32 1e-05, %v1077_v21 }
 0x77e   : > { %1556 = vrsqrt.f32 %v1078_v22 }
 0x78b   : > { %v1557_v23 = vpop.eup %1556 }
 0x78c   : > { %v1080_v25 = vmul.f32 %v1557_v23, %v1072_v16 }
 0x78e   : > { %v1087_v27 = vmul.f32 %v1363_v24, %v1080_v25 }
 0x790   : > { %v1094_v28 = vadd.f32 %v1364_v26, %v1087_v27 }
 0x792   : > { %v1095_v29 = vpack.c.bf16 %v1094_v28, %v1094_v28 }
 0x794   : > { %1483 = vmatmul.mubr.msk.bf16.vlgmr.msra.gmra.mxu0 %vm440_vm0, %v1095_v29 }
 0x854   : > { %v1156_v39 = vpop.f32.mrf.mxu0 }
 0x855   : > { %v1157_v40 = vadd.f32 %v1365_v38, %v1156_v39 }
 0x856   : > { %v1484_v41 = vpop.f32.mrf.mxu0 }
 0x857   : > { %v1163_v42 = vmul.f32 0.044715, %v1157_v40  ;;  %v1162_v50 = vmul.f32 0.5, %v1157_v40 }
 0x858   : > { %v1159_v43 = vpop.f32.mrf.mxu0 }
 0x859   : > { %v1164_v44 = vmul.f32 %v1163_v42, %v1157_v40 }
 0x85a   : > { %v1485_v45 = vpop.f32.mrf.mxu0 }
 0x85b   : > { %v1165_v46 = vmul.f32 %v1164_v44, %v1157_v40 }
 0x85d   : > { %v1166_v47 = vadd.f32 %v1165_v46, %v1157_v40 }
 0x85f   : > { %v1167_v48 = vmul.f32 0.7978846, %v1166_v47 }
 0x861   : > { %1558 = vtanh.f32 %v1167_v48 }
 0x86e   : > { %v1559_v49 = vpop.eup %1558 }
 0x86f   : > { %v1169_v8 = vadd.f32 1.0, %v1559_v49 }
 0x871   : > { %v1170_v51 = vmul.f32 %v1169_v8, %v1162_v50 }
 0x873   : > { %v1171_v52 = vpack.c.bf16 %v1170_v51, %v1170_v51 }
 0x875   : > { %1503 = vmatmul.mubr.bf16.vlgmr.msra.gmra.mxu1 %v1171_v52 }
 0x935   : > { %v1277_v54 = vpop.f32.mrf.mxu1 }
 0x936   : > { %v1278_v55 = vadd.f32 %v1369_v53, %v1277_v54 }
 0x937   : > { %v1504_v56 = vpop.f32.mrf.mxu1 }
 0x938   : > { %v1283_v57 = vadd.f32 %v1278_v55, %v1769_v10 }
 0x939   : > { %v1280_v58 = vpop.f32.mrf.mxu1 }
 0x93a   : > { %1284 = vst.msk [vmem:[%s435_s29] sm:$0xff] %vm440_vm0, %v1283_v57 }
 0x93b   : > { %v1505_v59 = vpop.f32.mrf.mxu1 }
 0x93c PF: > { %s23_s25 = sadd.s32 1, %s1566_s25  }
 0x93d   : > { %p20_p4 = scmp.ge.s32.totalorder %s23_s25, 4  }
 0x93f   :  { %22 = sbr.rel (!%p20_p4) target bundleno = 1 (0x1), region = 102 }

</bundles_post_ra>
